<compile_context>
chip_gen: v7x
topology: tpu7x:2x2x1
jax: 0.10.0
libtpu: 0.0.40
codegen_flags: <defaults>
</compile_context>

<pallas_src>
import jax
import jax.numpy as jnp
from jax.experimental import pallas as pl
from jax.experimental.pallas import tpu as pltpu


def _round_up(v, m):
    return ((v + m - 1) // m) * m


def _make_dense_kernel(num_layers):
    """Fused MLP kernel: x @ W0 + b0 -> ReLU -> ... -> x @ W_last + b_last."""

    def kernel(*refs):
        x_ref = refs[0]
        w_refs = refs[1:1 + num_layers]
        b_refs = refs[1 + num_layers:1 + 2 * num_layers]
        o_ref = refs[-1]

        # First layer: feed operands in their stored dtype (native MXU path), f32 acc.
        h = jnp.dot(x_ref[...], w_refs[0][...], preferred_element_type=jnp.float32)
        h = h + b_refs[0][...]                       # (1, out) broadcasts over rows
        for li in range(1, num_layers):
            h = jnp.maximum(h, 0.0)                  # activation_fn = ReLU
            # Cast the f32 accumulator back to the weight dtype so bf16 weights keep
            # the bf16xbf16->f32 MXU fast path (no-op when weights are f32).
            h = jnp.dot(h.astype(w_refs[li].dtype), w_refs[li][...],
                        preferred_element_type=jnp.float32)
            h = h + b_refs[li][...]
        o_ref[...] = h.astype(o_ref.dtype)

    return kernel


def dense_forward(x, weights, biases, *, block_b=None):
    """JAX/Pallas equivalent of Dense.forward (dropout / BN / IN / WN disabled).

    x:        any shape whose trailing dims flatten to input_size (View([-1, input_size])).
    weights:  list of (fan_in, fan_out) matrices, last one projects to latent_size.
    biases:   list of (fan_out,) vectors.
    block_b:  batch-tile rows (sweepable); default is generation-friendly adaptive.
    """
    assert len(weights) == len(biases) and len(weights) >= 1
    input_size = weights[0].shape[0]
    latent_size = weights[-1].shape[1]
    num_layers = len(weights)

    # View([-1, input_size]) — layout plumbing stays in the wrapper.
    x2 = x.reshape(-1, input_size)
    b = x2.shape[0]

    # Sublane granularity: 8 rows for 32-bit, 16 rows for 16-bit packed dtypes.
    sub = 16 if jnp.dtype(x2.dtype).itemsize < 4 else 8
    b_sub = _round_up(b, sub)

    if block_b is None:
        # Target ~256-row tiles (full 256x256 MXU occupancy on v6e/v7x; v5e's 128x128
        # MXU is already saturated) while keeping >=2 tiles so both v7x TensorCores
        # get work.  Don't exceed the (sublane-rounded) batch.
        block_b = min(256, max(sub, _round_up(pl.cdiv(b_sub, 2), sub)))
    else:
        block_b = max(sub, _round_up(block_b, sub))

    nb = pl.cdiv(b_sub, block_b)
    b_pad = nb * block_b
    if b_pad != b:
        # Only triggers when the adaptive tile doesn't divide the batch; pad < block_b rows.
        x2 = jnp.pad(x2, ((0, b_pad - b), (0, 0)))

    # Biases as (1, out) so they broadcast cleanly inside the kernel.
    b2d = [bi.reshape(1, -1) for bi in biases]

    in_specs = [pl.BlockSpec((block_b, input_size), lambda i: (i, 0))]
    for w in weights:
        # Constant block index -> stays resident in VMEM across all grid steps.
        # TODO(synk): could add pipeline_mode=pl.Buffered(1) to single-buffer these on v5e.
        in_specs.append(pl.BlockSpec(w.shape, lambda i: (0, 0)))
    for bb in b2d:
        in_specs.append(pl.BlockSpec(bb.shape, lambda i: (0, 0)))

    itemsize = jnp.dtype(x2.dtype).itemsize
    flops = 2 * b_pad * sum(int(w.shape[0]) * int(w.shape[1]) for w in weights)
    bytes_accessed = (
        b_pad * input_size * itemsize
        + sum(int(w.size) * jnp.dtype(w.dtype).itemsize for w in weights)
        + sum(int(bi.size) * jnp.dtype(bi.dtype).itemsize for bi in biases)
        + b_pad * latent_size * itemsize
    )
    cost = pl.CostEstimate(flops=flops, transcendentals=0, bytes_accessed=bytes_accessed)

    out = pl.pallas_call(
        _make_dense_kernel(num_layers),
        out_shape=jax.ShapeDtypeStruct((b_pad, latent_size), x.dtype),
        grid=(nb,),
        in_specs=in_specs,
        out_specs=pl.BlockSpec((block_b, latent_size), lambda i: (i, 0)),
        compiler_params=pltpu.CompilerParams(
            dimension_semantics=("parallel",),   # batch tiles shard across v7x's 2 TCs
        ),
        cost_estimate=cost,
    )(x2, *weights, *b2d)

    return out[:b] if b_pad != b else out


# TODO(synk): use_dropout (AlphaDropout), use_bn / use_in normalization and weight_norm
#             variants of Dense are not implemented (module defaults leave them off).

if __name__ == "__main__":
    key = jax.random.PRNGKey(0)

    # Small NCHW input, consistent with the module: flatten -> input_size = 4*16*16 = 1024.
    batch, channels, spatial = 16, 4, 16
    input_size = channels * spatial * spatial          # 1024
    layer_sizes = [512, 256]                           # hidden widths (multiples of 128)
    latent_size = 128

    sizes = [input_size] + layer_sizes + [latent_size]
    num_layers = len(sizes) - 1
    keys = jax.random.split(key, 1 + 2 * num_layers)

    x = jax.random.normal(keys[0], (batch, channels, spatial, spatial), dtype=jnp.float32)

    # nn.Linear-style init: U(-1/sqrt(fan_in), 1/sqrt(fan_in)).
    weights, biases = [], []
    for li, (fan_in, fan_out) in enumerate(zip(sizes[:-1], sizes[1:])):
        scale = 1.0 / float(fan_in) ** 0.5
        weights.append(jax.random.uniform(keys[1 + 2 * li], (fan_in, fan_out),
                                          jnp.float32, -scale, scale))
        biases.append(jax.random.uniform(keys[2 + 2 * li], (fan_out,),
                                         jnp.float32, -scale, scale))

    y = jax.block_until_ready(dense_forward(x, weights, biases))

    # Pure-JAX reference of the same forward.
    h = x.reshape(-1, input_size)
    for li in range(num_layers):
        h = h @ weights[li] + biases[li]
        if li < num_layers - 1:
            h = jnp.maximum(h, 0.0)

    assert y.shape == (batch, latent_size)
    assert y.dtype == x.dtype
    assert jnp.allclose(y, h, atol=2e-3, rtol=2e-3)

    print("KERNEL_OK")
</pallas_src>

<mosaic_0001>
module attributes {stable_mosaic.version = 11 : i64} {
  func.func @kernel(%arg0: i32, %arg1: memref<8x1024xf32, #tpu.memory_space<vmem>>, %arg2: memref<1024x512xf32, #tpu.memory_space<vmem>>, %arg3: memref<512x256xf32, #tpu.memory_space<vmem>>, %arg4: memref<256x128xf32, #tpu.memory_space<vmem>>, %arg5: memref<1x512xf32, #tpu.memory_space<vmem>>, %arg6: memref<1x256xf32, #tpu.memory_space<vmem>>, %arg7: memref<1x128xf32, #tpu.memory_space<vmem>>, %arg8: memref<8x128xf32, #tpu.memory_space<vmem>>) attributes {dimension_semantics = [#tpu.dimension_semantics<parallel>], iteration_bounds = array<i64: 2>, scalar_prefetch = 0 : i64, scratch_operands = 0 : i64, tpu.core_type = #tpu.core_type<tc>, window_params = [{transform_indices = @transform_0, window_bounds = array<i64: 8, 1024>}, {pipeline_mode = #tpu.pipeline_mode<synchronous>, transform_indices = @transform_1, window_bounds = array<i64: 1024, 512>}, {pipeline_mode = #tpu.pipeline_mode<synchronous>, transform_indices = @transform_2, window_bounds = array<i64: 512, 256>}, {pipeline_mode = #tpu.pipeline_mode<synchronous>, transform_indices = @transform_3, window_bounds = array<i64: 256, 128>}, {pipeline_mode = #tpu.pipeline_mode<synchronous>, transform_indices = @transform_4, window_bounds = array<i64: 1, 512>}, {pipeline_mode = #tpu.pipeline_mode<synchronous>, transform_indices = @transform_5, window_bounds = array<i64: 1, 256>}, {pipeline_mode = #tpu.pipeline_mode<synchronous>, transform_indices = @transform_6, window_bounds = array<i64: 1, 128>}, {transform_indices = @transform_7, window_bounds = array<i64: 8, 128>}]} {
    %c0 = arith.constant 0 : index
    %c0_0 = arith.constant 0 : index
    %0 = vector.load %arg1[%c0, %c0_0] : memref<8x1024xf32, #tpu.memory_space<vmem>>, vector<8x1024xf32>
    %c0_1 = arith.constant 0 : index
    %c0_2 = arith.constant 0 : index
    %1 = vector.load %arg2[%c0_1, %c0_2] : memref<1024x512xf32, #tpu.memory_space<vmem>>, vector<1024x512xf32>
    %cst = arith.constant dense<0.000000e+00> : vector<8x512xf32>
    %2 = tpu.matmul %0, %1, %cst {dimension_numbers = #tpu.dot_dimension_numbers<[1], [0], [0], [1], [0, 0, 1, 1], [], []>} : vector<8x1024xf32>, vector<1024x512xf32>, vector<8x512xf32> -> vector<8x512xf32>
    %c0_3 = arith.constant 0 : index
    %c0_4 = arith.constant 0 : index
    %3 = vector.load %arg5[%c0_3, %c0_4] : memref<1x512xf32, #tpu.memory_space<vmem>>, vector<1x512xf32>
    %4 = vector.broadcast %3 : vector<1x512xf32> to vector<8x512xf32>
    %5 = arith.addf %2, %4 : vector<8x512xf32>
    %cst_5 = arith.constant 0.000000e+00 : f32
    %6 = vector.broadcast %cst_5 : f32 to vector<8x512xf32>
    %7 = arith.maximumf %5, %6 : vector<8x512xf32>
    %c0_6 = arith.constant 0 : index
    %c0_7 = arith.constant 0 : index
    %8 = vector.load %arg3[%c0_6, %c0_7] : memref<512x256xf32, #tpu.memory_space<vmem>>, vector<512x256xf32>
    %cst_8 = arith.constant dense<0.000000e+00> : vector<8x256xf32>
    %9 = tpu.matmul %7, %8, %cst_8 {dimension_numbers = #tpu.dot_dimension_numbers<[1], [0], [0], [1], [0, 0, 1, 1], [], []>} : vector<8x512xf32>, vector<512x256xf32>, vector<8x256xf32> -> vector<8x256xf32>
    %c0_9 = arith.constant 0 : index
    %c0_10 = arith.constant 0 : index
    %10 = vector.load %arg6[%c0_9, %c0_10] : memref<1x256xf32, #tpu.memory_space<vmem>>, vector<1x256xf32>
    %11 = vector.broadcast %10 : vector<1x256xf32> to vector<8x256xf32>
    %12 = arith.addf %9, %11 : vector<8x256xf32>
    %cst_11 = arith.constant 0.000000e+00 : f32
    %13 = vector.broadcast %cst_11 : f32 to vector<8x256xf32>
    %14 = arith.maximumf %12, %13 : vector<8x256xf32>
    %c0_12 = arith.constant 0 : index
    %c0_13 = arith.constant 0 : index
    %15 = vector.load %arg4[%c0_12, %c0_13] : memref<256x128xf32, #tpu.memory_space<vmem>>, vector<256x128xf32>
    %cst_14 = arith.constant dense<0.000000e+00> : vector<8x128xf32>
    %16 = tpu.matmul %14, %15, %cst_14 {dimension_numbers = #tpu.dot_dimension_numbers<[1], [0], [0], [1], [0, 0, 1, 1], [], []>} : vector<8x256xf32>, vector<256x128xf32>, vector<8x128xf32> -> vector<8x128xf32>
    %c0_15 = arith.constant 0 : index
    %c0_16 = arith.constant 0 : index
    %17 = vector.load %arg7[%c0_15, %c0_16] : memref<1x128xf32, #tpu.memory_space<vmem>>, vector<1x128xf32>
    %18 = vector.broadcast %17 : vector<1x128xf32> to vector<8x128xf32>
    %19 = arith.addf %16, %18 : vector<8x128xf32>
    %c0_17 = arith.constant 0 : index
    %c0_18 = arith.constant 0 : index
    %20 = vector.load %arg8[%c0_17, %c0_18] : memref<8x128xf32, #tpu.memory_space<vmem>>, vector<8x128xf32>
    tpu.vector_store %arg8[%c0_17, %c0_18], %19 {strides = array<i32>} : memref<8x128xf32, #tpu.memory_space<vmem>>, vector<8x128xf32>,
    return
  }
  func.func @transform_0(%arg0: i32) -> (i32, i32) {
    %c0_i32 = arith.constant 0 : i32
    %c0_i32_0 = arith.constant 0 : i32
    return %arg0, %c0_i32 : i32, i32
  }
  func.func @transform_1(%arg0: i32) -> (i32, i32) {
    %c0_i32 = arith.constant 0 : i32
    %c0_i32_0 = arith.constant 0 : i32
    %c0_i32_1 = arith.constant 0 : i32
    return %c0_i32, %c0_i32_0 : i32, i32
  }
  func.func @transform_2(%arg0: i32) -> (i32, i32) {
    %c0_i32 = arith.constant 0 : i32
    %c0_i32_0 = arith.constant 0 : i32
    %c0_i32_1 = arith.constant 0 : i32
    return %c0_i32, %c0_i32_0 : i32, i32
  }
  func.func @transform_3(%arg0: i32) -> (i32, i32) {
    %c0_i32 = arith.constant 0 : i32
    %c0_i32_0 = arith.constant 0 : i32
    %c0_i32_1 = arith.constant 0 : i32
    return %c0_i32, %c0_i32_0 : i32, i32
  }
  func.func @transform_4(%arg0: i32) -> (i32, i32) {
    %c0_i32 = arith.constant 0 : i32
    %c0_i32_0 = arith.constant 0 : i32
    %c0_i32_1 = arith.constant 0 : i32
    return %c0_i32, %c0_i32_0 : i32, i32
  }
  func.func @transform_5(%arg0: i32) -> (i32, i32) {
    %c0_i32 = arith.constant 0 : i32
    %c0_i32_0 = arith.constant 0 : i32
    %c0_i32_1 = arith.constant 0 : i32
    return %c0_i32, %c0_i32_0 : i32, i32
  }
  func.func @transform_6(%arg0: i32) -> (i32, i32) {
    %c0_i32 = arith.constant 0 : i32
    %c0_i32_0 = arith.constant 0 : i32
    %c0_i32_1 = arith.constant 0 : i32
    return %c0_i32, %c0_i32_0 : i32, i32
  }
  func.func @transform_7(%arg0: i32) -> (i32, i32) {
    %c0_i32 = arith.constant 0 : i32
    %c0_i32_0 = arith.constant 0 : i32
    return %arg0, %c0_i32 : i32, i32
  }
}

</mosaic_0001>

<bundles_post_ra>
// kernel: tpu_custom_call.1
= control target key start
LH: loop header
LB: loop body
LE: loop exit
PB: predicated region body
PF: predicated region fallthrough
CT: control target
= control target key end

     0   :  { %12 = vsyncpa [#allocation3], 0  ;;  %s3615_s0 = inlined_call_operand.hbm [shape: f32[16,1024], index: 0, kind: input, shape index: {}]   ;;  %s3616_s1 = inlined_call_operand.hbm [shape: f32[1024,512], index: 1, kind: input, shape index: {}]   ;;  %s3617_s2 = inlined_call_operand.hbm [shape: f32[512,256], index: 2, kind: input, shape index: {}]   ;;  %s3618_s3 = inlined_call_operand.hbm [shape: f32[256,128], index: 3, kind: input, shape index: {}]   ;;  %s3619_s4 = inlined_call_operand.hbm [shape: f32[1,512], index: 4, kind: input, shape index: {}]   ;;  %s3620_s5 = inlined_call_operand.hbm [shape: f32[1,256], index: 5, kind: input, shape index: {}]   ;;  %s3621_s6 = inlined_call_operand.hbm [shape: f32[1,128], index: 6, kind: input, shape index: {}]   ;;  %s3622_s7 = inlined_call_operand.hbm [shape: f32[16,128], index: 7, kind: output, shape index: {}]  }
   0x1   :  { %14 = vsyncpa [#allocation3 + $0x1], 0 }
   0x2   :  { %15 = vsyncpa [#allocation6], 0 }
   0x3   :  { %16 = vsyncpa [#allocation9], 0 }
   0x4   :  { %17 = vsyncpa [#allocation12], 0 }
   0x5   :  { %18 = vsyncpa [#allocation4], 0 }
   0x6   :  { %20 = vsyncpa [#allocation4 + $0x1], 0  ;;  %s3225_s24 = smov 0   ;;  %s3227_s25 = smov 0  }
   0x7   :  { %s3229_s26 = smov 0   ;;  %s3231_s27 = smov 0  }
   0x8 LB: > { %s3171_s28 = smov [#allocation5]   ;;  %s3246_s30 = sadd.s32 4294967295, %s3169_s27   ;;  %s3169_s27 = sphi %s3231_s27, %s3648_s27   ;;  %s3165_s26 = sphi %s3229_s26, %s3647_s26   ;;  %s3161_s25 = sphi %s3227_s25, %s3646_s25   ;;  %s3157_s24 = sphi %s3225_s24, %s3645_s24  }
   0x9   : > { %s221_s29 = sshll.u32 %s3171_s28, 4  ;;  %p2026_p0 = scmp.ge.s32.totalorder %s3169_s27, 1  ;;  %s3251_s29 = int_to_ptr.vmem [resolvable:$true] %s221_s29 }
   0xa   : > { %p3623_p1 = scmp.eq.s32.totalorder %s3246_s30, 0  ;;  %p209_p2 = scmp.lt.s32.totalorder %s3169_s27, 3 }
   0xb   : > { %s3172_s9 = smov [#allocation8]   ;;  %s3173_s12 = smov [#allocation11]  }
   0xc   : > { %p3253_p3 = pnand %p2026_p0, %p209_p2  ;;  %s247_s10 = sshll.u32 %s3172_s9, 4  ;;  %s3266_s10 = int_to_ptr.vmem [resolvable:$true] %s247_s10 }
   0xd   : > { %s3268_s13 = sshll.u32 %s3173_s12, 4  ;;  %s2893_s16 = scalar_lea.hbm %s3616_s1, 65536  ;;  %s273_s13 = int_to_ptr.vmem [resolvable:$true] %s3268_s13 }
   0xe   : > { %s3626_s8 = scalar_select %p3253_p3, 1, 0 }
   0xf   : > { %p2807_p5 = pneg %p3253_p3  ;;  %p2894_p7 = scmp.ne.s32.totalorder %s3616_s1, %s2893_s16 }
  0x10   : > { %p2900_p11 = scmp.lt.u32.totalorder %s2893_s16, %s3616_s1 }
  0x11   : > { %p3262_p6 = pnand %p2807_p5, %p3623_p1 }
  0x13   : > { %p3278_p8 = pneg %p3262_p6 }
  0x15   : > { %p2896_p9 = pnand %p3278_p8, %p2894_p7 }
  0x17   : > { %p2897_p10 = pneg %p2896_p9 }
  0x19   : > { %p2902_p12 = pnand %p2900_p11, %p2897_p10 }
  0x1b   : > { %2905 = shalt.err (!%p2902_p12)
}
  0x1c   : > { %s2906_s22 = scalar_lea.vmem %s3251_s29, 65536  ;;  %p2914_p5 = scmp.lt.s32.totalorder %s3251_s29, %s3251_s29 }
  0x1d   : > { %p2907_p13 = scmp.ne.s32.totalorder %s3251_s29, %s2906_s22  ;;  %p2915_p4 = scmp.lt.s32.totalorder %s2906_s22, %s2906_s22 }
  0x1f   : > { %p2909_p0 = pnand %p2907_p13, %p3278_p8  ;;  %p2916_p7 = por %p2915_p4, %p2914_p5 }
  0x21   : > { %p2910_p2 = pneg %p2909_p0 }
  0x23   : > { %p2917_p9 = pnand %p2916_p7, %p2910_p2 }
  0x25   : > { %2920 = shalt.err (!%p2917_p9)
}
  0x26   : > { %s3174_s23 = smov 512   ;;  %s3175_s28 = smov 32  }
  0x27   : > { %2810 = dma.hbm_to_vmem [thread:$0]  (!%p3262_p6), %s3616_s1, 65536, %s3251_s29, [#allocation6], %s3174_s23, %s3174_s23, %s3175_s28  }
  0x28   : > { %s2921_s16 = scalar_lea.hbm %s3618_s3, 4096 }
  0x29   : > { %p2922_p4 = scmp.ne.s32.totalorder %s3618_s3, %s2921_s16  ;;  %p2928_p12 = scmp.lt.u32.totalorder %s2921_s16, %s3618_s3 }
  0x2b   : > { %p2924_p10 = pnand %p2922_p4, %p3278_p8 }
  0x2d   : > { %p2925_p11 = pneg %p2924_p10 }
  0x2f   : > { %p2930_p13 = pnand %p2928_p12, %p2925_p11 }
  0x31   : > { %2933 = shalt.err (!%p2930_p13)
}
  0x32   : > { %s2934_s29 = scalar_lea.vmem %s3266_s10, 4096  ;;  %p2942_p7 = scmp.lt.s32.totalorder %s3266_s10, %s3266_s10 }
  0x33   : > { %p2935_p0 = scmp.ne.s32.totalorder %s3266_s10, %s2934_s29  ;;  %p2943_p9 = scmp.lt.s32.totalorder %s2934_s29, %s2934_s29 }
  0x35   : > { %p2937_p2 = pnand %p2935_p0, %p3278_p8  ;;  %p2944_p4 = por %p2943_p9, %p2942_p7 }
  0x37   : > { %p2938_p5 = pneg %p2937_p2 }
  0x39   : > { %p2945_p10 = pnand %p2944_p4, %p2938_p5 }
  0x3b   : > { %2948 = shalt.err (!%p2945_p10)
}
  0x3c   : > { %s3176_s22 = smov 128   ;;  %s3177_s23 = smov 8  }
  0x3d   : > { %2816 = dma.hbm_to_vmem [thread:$0]  (!%p3262_p6), %s3618_s3, 4096, %s3266_s10, [#allocation9], %s3176_s22, %s3176_s22, %s3177_s23  }
  0x3e   : > { %s2949_s15 = scalar_lea.hbm %s3620_s5, 32 }
  0x3f   : > { %p2950_p11 = scmp.ne.s32.totalorder %s3620_s5, %s2949_s15  ;;  %p2956_p0 = scmp.lt.u32.totalorder %s2949_s15, %s3620_s5 }
  0x41   : > { %p2952_p12 = pnand %p2950_p11, %p3278_p8 }
  0x43   : > { %p2953_p13 = pneg %p2952_p12 }
  0x45   : > { %p2958_p2 = pnand %p2956_p0, %p2953_p13 }
  0x47   : > { %2961 = shalt.err (!%p2958_p2)
}
  0x48   : > { %s2962_s21 = scalar_lea.vmem %s273_s13, 32  ;;  %p2970_p4 = scmp.lt.s32.totalorder %s273_s13, %s273_s13 }
  0x49   : > { %p2963_p5 = scmp.ne.s32.totalorder %s273_s13, %s2962_s21  ;;  %p2971_p10 = scmp.lt.s32.totalorder %s2962_s21, %s2962_s21 }
  0x4b   : > { %p2965_p7 = pnand %p2963_p5, %p3278_p8  ;;  %p2972_p1 = por %p2971_p10, %p2970_p4 }
  0x4d   : > { %p2966_p9 = pneg %p2965_p7 }
  0x4f   : > { %p2973_p3 = pnand %p2972_p1, %p2966_p9 }
  0x51   : > { %2976 = shalt.err (!%p2973_p3)
}
  0x52   : > { %2822 = dma.hbm_to_vmem [thread:$0]  (!%p3262_p6), %s3620_s5, 32, %s273_s13, [#allocation12]  }
  0x53   : > { %s3178_s22 = smov [#allocation7]   ;;  %s2977_s12 = scalar_lea.hbm %s3617_s2, 16384 }
  0x54   : > { %s234_s23 = sshll.u32 %s3178_s22, 4  ;;  %p2978_p11 = scmp.ne.s32.totalorder %s3617_s2, %s2977_s12  ;;  %s235_s23 = int_to_ptr.vmem [resolvable:$true] %s234_s23 }
  0x55   : > { %p2984_p12 = scmp.lt.u32.totalorder %s2977_s12, %s3617_s2 }
  0x56   : > { %p2980_p1 = pnand %p2978_p11, %p3278_p8 }
  0x58   : > { %p2981_p3 = pneg %p2980_p1 }
  0x5a   : > { %p2986_p13 = pnand %p2984_p12, %p2981_p3 }
  0x5c   : > { %2989 = shalt.err (!%p2986_p13)
}
  0x5d   : > { %s2990_s13 = scalar_lea.vmem %s235_s23, 16384  ;;  %p2998_p7 = scmp.lt.s32.totalorder %s235_s23, %s235_s23 }
  0x5e   : > { %p2991_p0 = scmp.ne.s32.totalorder %s235_s23, %s2990_s13  ;;  %p2999_p9 = scmp.lt.s32.totalorder %s2990_s13, %s2990_s13 }
  0x60   : > { %p2993_p2 = pnand %p2991_p0, %p3278_p8  ;;  %p3000_p4 = por %p2999_p9, %p2998_p7 }
  0x62   : > { %p2994_p5 = pneg %p2993_p2 }
  0x64   : > { %p3001_p10 = pnand %p3000_p4, %p2994_p5 }
  0x66   : > { %3004 = shalt.err (!%p3001_p10)
}
  0x67   : > { %s3179_s18 = smov 256   ;;  %s3180_s20 = smov 16  }
  0x68   : > { %2813 = dma.hbm_to_vmem [thread:$0]  (!%p3262_p6), %s3617_s2, 16384, %s235_s23, [#allocation6], %s3179_s18, %s3179_s18, %s3180_s20  }
  0x69   : > { %s3181_s29 = smov [#allocation10]   ;;  %s3182_s28 = smov [#allocation13]  }
  0x6a   : > { %s261_s22 = sshll.u32 %s3181_s29, 4  ;;  %s283_s9 = sshll.u32 %s3182_s28, 4  ;;  %s262_s22 = int_to_ptr.vmem [resolvable:$true] %s261_s22  ;;  %s3359_s9 = int_to_ptr.vmem [resolvable:$true] %s283_s9 }
  0x6b   : > { %s3005_s15 = scalar_lea.hbm %s3619_s4, 64 }
  0x6c   : > { %p3006_p11 = scmp.ne.s32.totalorder %s3619_s4, %s3005_s15  ;;  %p3012_p12 = scmp.lt.u32.totalorder %s3005_s15, %s3619_s4 }
  0x6e   : > { %p3008_p1 = pnand %p3006_p11, %p3278_p8 }
  0x70   : > { %p3009_p3 = pneg %p3008_p1 }
  0x72   : > { %p3014_p13 = pnand %p3012_p12, %p3009_p3 }
  0x74   : > { %3017 = shalt.err (!%p3014_p13)
}
  0x75   : > { %s3018_s18 = scalar_lea.vmem %s262_s22, 64  ;;  %p3026_p7 = scmp.lt.s32.totalorder %s262_s22, %s262_s22 }
  0x76   : > { %p3019_p0 = scmp.ne.s32.totalorder %s262_s22, %s3018_s18  ;;  %p3027_p9 = scmp.lt.s32.totalorder %s3018_s18, %s3018_s18 }
  0x78   : > { %p3021_p2 = pnand %p3019_p0, %p3278_p8  ;;  %p3028_p4 = por %p3027_p9, %p3026_p7 }
  0x7a   : > { %p3022_p5 = pneg %p3021_p2 }
  0x7c   : > { %p3029_p10 = pnand %p3028_p4, %p3022_p5 }
  0x7e   : > { %3032 = shalt.err (!%p3029_p10)
}
  0x7f   : > { %2819 = dma.hbm_to_vmem [thread:$0]  (!%p3262_p6), %s3619_s4, 64, %s262_s22, [#allocation9]  }
  0x80   : > { %s3033_s28 = scalar_lea.hbm %s3621_s6, 16 }
  0x81   : > { %p3034_p11 = scmp.ne.s32.totalorder %s3621_s6, %s3033_s28  ;;  %p3040_p12 = scmp.lt.u32.totalorder %s3033_s28, %s3621_s6 }
  0x83   : > { %p3036_p1 = pnand %p3034_p11, %p3278_p8 }
  0x85   : > { %p3037_p3 = pneg %p3036_p1 }
  0x87   : > { %p3042_p13 = pnand %p3040_p12, %p3037_p3 }
  0x89   : > { %3045 = shalt.err (!%p3042_p13)
}
  0x8a   : > { %s3046_s22 = scalar_lea.vmem %s3359_s9, 16  ;;  %s3053_s17 = scalar_lea.vmem %s3359_s9, 32 }
  0x8b   : > { %p3047_p0 = scmp.ne.s32.totalorder %s3359_s9, %s3046_s22  ;;  %p3054_p7 = scmp.lt.s32.totalorder %s3359_s9, %s3359_s9 }
  0x8c   : > { %p3055_p9 = scmp.lt.s32.totalorder %s3053_s17, %s3046_s22 }
  0x8d   : > { %p3049_p2 = pnand %p3047_p0, %p3278_p8 }
  0x8e   : > { %p3056_p4 = por %p3055_p9, %p3054_p7 }
  0x8f   : > { %p3050_p5 = pneg %p3049_p2 }
  0x91   : > { %p3057_p10 = pnand %p3056_p4, %p3050_p5 }
  0x93   : > { %3060 = shalt.err (!%p3057_p10)
}
  0x94   : > { %2825 = dma.hbm_to_vmem [thread:$0]  (!%p3262_p6), %s3621_s6, 16, %s3359_s9, [#allocation12]  }
  0x95   : > { %s2025_s11 = sadd.s32 4294967294, %s3169_s27   ;;  %s3405_s19 = sadd.s32 1, %s3169_s27  }
  0x96   : > { %s30_s18 = ssub.s32 %s3169_s27, %s3405_s19  ;;  %s33_s20 = sadd.s32 1, %s3165_s26 }
  0x97   : > { %p31_p8 = scmp.eq.s32.totalorder %s30_s18, 0  ;;  %p40_p11 = scmp.ne.s32.totalorder %s3165_s26, %s3161_s25 }
  0x98   : > { %p41_p1 = scmp.eq.s32.totalorder %s3169_s27, 0  ;;  %p46_p3 = scmp.ne.s32.totalorder %s3161_s25, %s3157_s24 }
  0x99   : > { %s3416_s21 = scalar_select %p31_p8, %s3165_s26, %s33_s20  }
  0x9a   : > { %p3418_p12 = por %p41_p1, %p40_p11  ;;  %p3630_p13 = scmp.eq.s32.totalorder %s3246_s30, 0 }
  0x9b   : > { %p196_p0 = scmp.eq.s32.totalorder %s3246_s30, 1  ;;  %p202_p2 = scmp.eq.s32.totalorder %s2025_s11, 1 }
  0x9c   : > { %p3424_p6 = por %p3630_p13, %p46_p3  ;;  %p2840_p5 = scmp.lt.s32.totalorder %s3169_s27, 2 }
  0x9d   : > { %s294_s29 = sand.u32 1, %s3165_s26   ;;  %p3431_p7 = por %p196_p0, %p40_p11 }
  0x9e   : > { %p3435_p9 = por %p202_p2, %p46_p3  ;;  %s2034_s14 = sshll.u32 %s294_s29, 6 }
  0x9f   : > { %s3632_s28 = scalar_select %p3431_p7, 1, 0 }
  0xa0   : > { %s3633_s12 = scalar_select %p3435_p9, 1, 0 }
  0xa1   : > { %s2051_s15 = sshll.u32 %s3169_s27, 10  ;;  %s298_s13 = scalar_lea.vmem [#allocation2], %s2034_s14 }
  0xa2   : > { %s3443_s17 = scalar_lea.hbm %s3615_s0, %s2051_s15  ;;  %s306_s23 = sshll.u32 %s298_s13, 4  ;;  %s3445_s23 = int_to_ptr.vmem [resolvable:$true] %s306_s23 }
  0xa3   : > { %p3449_p4 = pnand %p2840_p5, %p3418_p12  ;;  %s295_s18 = scalar_lea.sflag [#allocation3], %s294_s29 }
  0xa4   : > { %s3061_s20 = scalar_lea.hbm %s3443_s17, 1024  ;;  %s3066_s16 = scalar_lea.hbm %s3615_s0, 2048 }
  0xa5   : > { %p3062_p10 = scmp.ne.s32.totalorder %s3443_s17, %s3061_s20  ;;  %p3063_p8 = pneg %p3449_p4 }
  0xa6   : > { %p3067_p3 = scmp.lt.u32.totalorder %s3443_s17, %s3615_s0  ;;  %p3068_p12 = scmp.lt.u32.totalorder %s3066_s16, %s3061_s20 }
  0xa7   : > { %p3064_p11 = pnand %p3063_p8, %p3062_p10  ;;  %p3070_p0 = scmp.lt.u32.totalorder %s3061_s20, %s3443_s17 }
  0xa8   : > { %p3069_p13 = por %p3068_p12, %p3067_p3 }
  0xa9   : > { %p3065_p1 = pneg %p3064_p11 }
  0xaa   : > { %p3071_p2 = por %p3070_p0, %p3069_p13 }
  0xac   : > { %p3072_p5 = pnand %p3071_p2, %p3065_p1 }
  0xae   : > { %3075 = shalt.err (!%p3072_p5)
}
  0xaf   : > { %s3076_s29 = scalar_lea.vmem %s3445_s23, 1024  ;;  %s3183_s13 = smov [#allocation2]  }
  0xb0   : > { %p3077_p10 = scmp.ne.s32.totalorder %s3445_s23, %s3076_s29  ;;  %s3081_s14 = sshll.u32 %s3183_s13, 4  ;;  %s3082_s14 = int_to_ptr.vmem [resolvable:$false] %s3081_s14 }
  0xb1   : > { %s3083_s15 = scalar_lea.vmem %s3082_s14, 2048  ;;  %p3084_p7 = scmp.lt.s32.totalorder %s3445_s23, %s3082_s14 }
  0xb2   : > { %p3079_p11 = pnand %p3077_p10, %p3063_p8  ;;  %p3085_p3 = scmp.lt.s32.totalorder %s3083_s15, %s3076_s29 }
  0xb4   : > { %p3080_p9 = pneg %p3079_p11  ;;  %p3086_p12 = por %p3085_p3, %p3084_p7 }
  0xb6   : > { %p3087_p13 = pnand %p3086_p12, %p3080_p9 }
  0xb8   : > { %3090 = shalt.err (!%p3087_p13)
}
  0xb9   : > { %2829 = dma.hbm_to_vmem [thread:$0]  (!%p3449_p4), %s3443_s17, 1024, %s3445_s23, %s295_s18  }
  0xba   : > { %p3635_p1 = scmp.ne.s32.totalorder %s3626_s8, 0 }
  0xbb   : > { %s3481_s20 = sand.u32 (!%p3635_p1), 1, %s3161_s25  }
  0xbc   : > { %315 = sbr.rel (%p3635_p1) target bundleno = 1197 (0x4ad), region = 48  ;;  %s2038_s16 = sshll.u32 (!%p3635_p1), %s3481_s20, 6 }
  0xbd   : > { %s318_s10 = scalar_lea.sflag (!%p3635_p1), [#allocation3], %s3481_s20  ;;  %s3485_s22 = scalar_lea.vmem (!%p3635_p1), [#allocation2], %s2038_s16 }
  0xc3   : > { %3136 = dma.done.wait (%p3424_p6), %s318_s10, 1024  }
  0xc4   : > { %3138 = vsyncadd (%p3424_p6), %s318_s10, 4294966272  ;;  %p3636_p7 = scmp.eq.s32.totalorder %s3246_s30, 0 }
  0xc6   : > { %3140 = dma.done.wait (%p3636_p7), [#allocation6], 81920   ;;  %p3637_p9 = pmov %p3636_p7 }
  0xc7   : > { %p3638_p4 = pmov %p3636_p7 }
  0xc8   : > { %3142 = vsyncadd (%p3637_p9), [#allocation6], 4294885376 }
  0xc9   : > { %3144 = dma.done.wait (%p3638_p4), [#allocation9], 4160   ;;  %p3639_p8 = pmov %p3638_p4 }
  0xca   : > { %p3640_p0 = pmov %p3638_p4 }
  0xcb   : > { %3146 = vsyncadd (%p3639_p8), [#allocation9], 4294963136 }
  0xcc   : > { %3148 = dma.done.wait (%p3640_p0), [#allocation12], 48   ;;  %p3641_p2 = pmov %p3640_p0 }
  0xcd   : > { %v385_v0 = vld [vmem:[#allocation5 + $0x8] sm:$0xff]  ;;  %v384_v5 = vld [vmem:[#allocation5] sm:$0xff]  ;;  %s2045_s8 = sshll.u32 %s3481_s20, 3  ;;  %s2048_s9 = sshll.u32 %s3246_s30, 7 }
  0xce   : > { %3150 = vsyncadd (%p3641_p2), [#allocation12], 4294967248  ;;  %v389_v1 = vld [vmem:[#allocation5 + $0x28] sm:$0xff]  ;;  %v388_v6 = vld [vmem:[#allocation5 + $0x20] sm:$0xff]  ;;  %s375_s17 = scalar_lea.vmem [#allocation14], %s2045_s8  ;;  %s3571_s29 = scalar_lea.hbm %s3622_s7, %s2048_s9 }
  0xcf   : > { %v513_v2 = vld [vmem:[#allocation5 + $0x408] sm:$0xff]  ;;  %v2087_v3 = vpack.c.bf16 %v389_v1, %v385_v0  ;;  %v2089_v8 = vpack.c.bf16 %v388_v6, %v384_v5  ;;  %v512_v9 = vld [vmem:[#allocation5 + $0x400] sm:$0xff]  ;;  %s1898_s23 = sshll.u32 %s375_s17, 4  ;;  %s1885_s13 = scalar_lea.sflag [#allocation4], %s3481_s20  ;;  %s3573_s23 = int_to_ptr.vmem [resolvable:$true] %s1898_s23 }
  0xd0   : > { %v517_v4 = vld [vmem:[#allocation5 + $0x428] sm:$0xff]  ;;  %v516_v10 = vld [vmem:[#allocation5 + $0x420] sm:$0xff]  ;;  %s3091_s14 = scalar_lea.vmem %s3573_s23, 128  ;;  %p3642_p5 = scmp.ne.s32.totalorder %s3632_s28, 0 }
  0xd1   : > { %v2151_v7 = vpack.c.bf16 %v517_v4, %v513_v2  ;;  %v393_v11 = vld [vmem:[#allocation5 + $0x48] sm:$0xff]  ;;  %2088 = vmatprep.subr.bf16.mxu1 %v2087_v3  ;;  %v2153_v12 = vpack.c.bf16 %v516_v10, %v512_v9  ;;  %v392_v18 = vld [vmem:[#allocation5 + $0x40] sm:$0xff]  ;;  %p3092_p6 = scmp.ne.s32.totalorder %s3573_s23, %s3091_s14  ;;  %s3184_s30 = smov [#allocation14]  }
  0xd2   : > { %v397_v13 = vld [vmem:[#allocation5 + $0x68] sm:$0xff]  ;;  %2090 = vmatpush1.bf16.msra.mxu1 %v2089_v8  ;;  %v396_v19 = vld [vmem:[#allocation5 + $0x60] sm:$0xff]  ;;  %s3095_s15 = sshll.u32 %s3184_s30, 4  ;;  %s3096_s15 = int_to_ptr.vmem [resolvable:$false] %s3095_s15 }
  0xd3   : > { %v521_v14 = vld [vmem:[#allocation5 + $0x448] sm:$0xff]  ;;  %2152 = vmatprep.subr.bf16.mxu0 %v2151_v7  ;;  %v2091_v16 = vpack.c.bf16 %v397_v13, %v393_v11  ;;  %v520_v20 = vld [vmem:[#allocation5 + $0x440] sm:$0xff]  ;;  %v2093_v21 = vpack.c.bf16 %v396_v19, %v392_v18  ;;  %p3093_p10 = pnand %p3092_p6, %p3642_p5  ;;  %s3097_s16 = scalar_lea.vmem %s3096_s15, 256 }
  0xd4   : > { %v525_v15 = vld [vmem:[#allocation5 + $0x468] sm:$0xff]  ;;  %2154 = vmatpush1.bf16.msra.mxu0 %v2153_v12  ;;  %v524_v22 = vld [vmem:[#allocation5 + $0x460] sm:$0xff]  ;;  %p3098_p3 = scmp.lt.s32.totalorder %s3573_s23, %s3096_s15  ;;  %p3099_p12 = scmp.lt.s32.totalorder %s3097_s16, %s3091_s14 }
  0xd5   : > { %v2155_v17 = vpack.c.bf16 %v525_v15, %v521_v14  ;;  %v401_v23 = vld [vmem:[#allocation5 + $0x88] sm:$0xff]  ;;  %2092 = vmatprep.subr.bf16.mxu1 %v2091_v16  ;;  %v2157_v25 = vpack.c.bf16 %v524_v22, %v520_v20  ;;  %v400_v29 = vld [vmem:[#allocation5 + $0x80] sm:$0xff]  ;;  %p3094_p11 = pneg %p3093_p10 }
  0xd6   : > { %v405_v24 = vld [vmem:[#allocation5 + $0xa8] sm:$0xff]  ;;  %v404_v31 = vld [vmem:[#allocation5 + $0xa0] sm:$0xff]  ;;  %2094 = vmatpush1.bf16.msra.mxu1 %v2093_v21  ;;  %p3100_p13 = por %p3099_p12, %p3098_p3 }
  0xd7   : > { %2156 = vmatprep.subr.bf16.mxu0 %v2155_v17  ;;  %v2095_v26 = vpack.c.bf16 %v405_v24, %v401_v23  ;;  %v529_v27 = vld [vmem:[#allocation5 + $0x488] sm:$0xff]  ;;  %v528_v32 = vld [vmem:[#allocation5 + $0x480] sm:$0xff]  ;;  %v2097_v34 = vpack.c.bf16 %v404_v31, %v400_v29 }
  0xd8   : > { %v533_v28 = vld [vmem:[#allocation5 + $0x4a8] sm:$0xff]  ;;  %v532_v33 = vld [vmem:[#allocation5 + $0x4a0] sm:$0xff]  ;;  %2158 = vmatpush1.bf16.msra.mxu0 %v2157_v25  ;;  %p3101_p1 = pnand %p3100_p13, %p3094_p11 }
  0xd9   : > { %v2159_v30 = vpack.c.bf16 %v533_v28, %v529_v27  ;;  %v409_v35 = vld [vmem:[#allocation5 + $0xc8] sm:$0xff]  ;;  %2096 = vmatprep.subr.bf16.mxu1 %v2095_v26  ;;  %v2161_v38 = vpack.c.bf16 %v532_v33, %v528_v32  ;;  %v408_v41 = vld [vmem:[#allocation5 + $0xc0] sm:$0xff] }
  0xda   : > { %v413_v36 = vld [vmem:[#allocation5 + $0xe8] sm:$0xff]  ;;  %v412_v42 = vld [vmem:[#allocation5 + $0xe0] sm:$0xff]  ;;  %2098 = vmatpush1.bf16.msra.mxu1 %v2097_v34 }
  0xdb   : > { %v537_v37 = vld [vmem:[#allocation5 + $0x4c8] sm:$0xff]  ;;  %v2099_v39 = vpack.c.bf16 %v413_v36, %v409_v35  ;;  %2160 = vmatprep.subr.bf16.mxu0 %v2159_v30  ;;  %v536_v44 = vld [vmem:[#allocation5 + $0x4c0] sm:$0xff]  ;;  %v2101_v50 = vpack.c.bf16 %v412_v42, %v408_v41 }
  0xdc   : > { %v541_v40 = vld [vmem:[#allocation5 + $0x4e8] sm:$0xff]  ;;  %v540_v45 = vld [vmem:[#allocation5 + $0x4e0] sm:$0xff]  ;;  %2162 = vmatpush1.bf16.msra.mxu0 %v2161_v38 }
  0xdd   : > { %v2163_v43 = vpack.c.bf16 %v541_v40, %v537_v37  ;;  %v417_v46 = vld [vmem:[#allocation5 + $0x108] sm:$0xff]  ;;  %2100 = vmatprep.subr.bf16.mxu1 %v2099_v39  ;;  %v2165_v51 = vpack.c.bf16 %v540_v45, %v536_v44  ;;  %v416_v53 = vld [vmem:[#allocation5 + $0x100] sm:$0xff] }
  0xde   : > { %v421_v47 = vld [vmem:[#allocation5 + $0x128] sm:$0xff]  ;;  %v420_v54 = vld [vmem:[#allocation5 + $0x120] sm:$0xff]  ;;  %2102 = vmatpush1.bf16.msra.mxu1 %v2101_v50 }
  0xdf   : > { %v545_v48 = vld [vmem:[#allocation5 + $0x508] sm:$0xff]  ;;  %v2103_v52 = vpack.c.bf16 %v421_v47, %v417_v46  ;;  %v544_v55 = vld [vmem:[#allocation5 + $0x500] sm:$0xff]  ;;  %2164 = vmatprep.subr.bf16.mxu0 %v2163_v43  ;;  %v2105_v62 = vpack.c.bf16 %v420_v54, %v416_v53 }
  0xe0   : > { %v549_v49 = vld [vmem:[#allocation5 + $0x528] sm:$0xff]  ;;  %v548_v57 = vld [vmem:[#allocation5 + $0x520] sm:$0xff]  ;;  %2166 = vmatpush1.bf16.msra.mxu0 %v2165_v51 }
  0xe1   : > { %v2167_v56 = vpack.c.bf16 %v549_v49, %v545_v48  ;;  %v425_v58 = vld [vmem:[#allocation5 + $0x148] sm:$0xff]  ;;  %2104 = vmatprep.subr.bf16.mxu1 %v2103_v52  ;;  %v2169_v63 = vpack.c.bf16 %v548_v57, %v544_v55  ;;  %v424_v1 = vld [vmem:[#allocation5 + $0x140] sm:$0xff] }
  0xe2   : > { %v429_v59 = vld [vmem:[#allocation5 + $0x168] sm:$0xff]  ;;  %v428_v2 = vld [vmem:[#allocation5 + $0x160] sm:$0xff]  ;;  %2106 = vmatpush1.bf16.msra.mxu1 %v2105_v62 }
  0xe3   : > { %v553_v60 = vld [vmem:[#allocation5 + $0x548] sm:$0xff]  ;;  %v2107_v0 = vpack.c.bf16 %v429_v59, %v425_v58  ;;  %v552_v3 = vld [vmem:[#allocation5 + $0x540] sm:$0xff]  ;;  %2168 = vmatprep.subr.bf16.mxu0 %v2167_v56  ;;  %v2109_v10 = vpack.c.bf16 %v428_v2, %v424_v1 }
  0xe4   : > { %v557_v61 = vld [vmem:[#allocation5 + $0x568] sm:$0xff]  ;;  %v556_v5 = vld [vmem:[#allocation5 + $0x560] sm:$0xff]  ;;  %2170 = vmatpush1.bf16.msra.mxu0 %v2169_v63 }
  0xe5   : > { %v2171_v4 = vpack.c.bf16 %v557_v61, %v553_v60  ;;  %v433_v6 = vld [vmem:[#allocation5 + $0x188] sm:$0xff]  ;;  %2108 = vmatprep.subr.bf16.mxu1 %v2107_v0  ;;  %v2173_v11 = vpack.c.bf16 %v556_v5, %v552_v3  ;;  %v432_v13 = vld [vmem:[#allocation5 + $0x180] sm:$0xff] }
  0xe6   : > { %v437_v7 = vld [vmem:[#allocation5 + $0x1a8] sm:$0xff]  ;;  %v436_v14 = vld [vmem:[#allocation5 + $0x1a0] sm:$0xff]  ;;  %2110 = vmatpush1.bf16.msra.mxu1 %v2109_v10 }
  0xe7   : > { %v561_v8 = vld [vmem:[#allocation5 + $0x588] sm:$0xff]  ;;  %v2111_v12 = vpack.c.bf16 %v437_v7, %v433_v6  ;;  %v560_v15 = vld [vmem:[#allocation5 + $0x580] sm:$0xff]  ;;  %2172 = vmatprep.subr.bf16.mxu0 %v2171_v4  ;;  %v2113_v22 = vpack.c.bf16 %v436_v14, %v432_v13 }
  0xe8   : > { %v565_v9 = vld [vmem:[#allocation5 + $0x5a8] sm:$0xff]  ;;  %v564_v17 = vld [vmem:[#allocation5 + $0x5a0] sm:$0xff]  ;;  %2174 = vmatpush1.bf16.msra.mxu0 %v2173_v11 }
  0xe9   : > { %v2175_v16 = vpack.c.bf16 %v565_v9, %v561_v8  ;;  %v441_v18 = vld [vmem:[#allocation5 + $0x1c8] sm:$0xff]  ;;  %2112 = vmatprep.subr.bf16.mxu1 %v2111_v12  ;;  %v2177_v23 = vpack.c.bf16 %v564_v17, %v560_v15  ;;  %v440_v25 = vld [vmem:[#allocation5 + $0x1c0] sm:$0xff] }
  0xea   : > { %v445_v19 = vld [vmem:[#allocation5 + $0x1e8] sm:$0xff]  ;;  %v444_v26 = vld [vmem:[#allocation5 + $0x1e0] sm:$0xff]  ;;  %2114 = vmatpush1.bf16.msra.mxu1 %v2113_v22 }
  0xeb   : > { %v569_v20 = vld [vmem:[#allocation5 + $0x5c8] sm:$0xff]  ;;  %v2115_v24 = vpack.c.bf16 %v445_v19, %v441_v18  ;;  %v568_v27 = vld [vmem:[#allocation5 + $0x5c0] sm:$0xff]  ;;  %2176 = vmatprep.subr.bf16.mxu0 %v2175_v16  ;;  %v2117_v34 = vpack.c.bf16 %v444_v26, %v440_v25  ;;  %v3508_v19 = vld [vmem:[%s3485_s22 + $0x18] sm:$0xff] }
  0xec   : > { %v573_v21 = vld [vmem:[#allocation5 + $0x5e8] sm:$0xff]  ;;  %v572_v29 = vld [vmem:[#allocation5 + $0x5e0] sm:$0xff]  ;;  %2178 = vmatpush1.bf16.msra.mxu0 %v2177_v23  ;;  %1053 = vmatprep.mubr.f32.mxu0 %v3508_v19 }
  0xed   : > { %v2179_v28 = vpack.c.bf16 %v573_v21, %v569_v20  ;;  %v449_v30 = vld [vmem:[#allocation5 + $0x208] sm:$0xff]  ;;  %2116 = vmatprep.subr.bf16.mxu1 %v2115_v24  ;;  %v2181_v35 = vpack.c.bf16 %v572_v29, %v568_v27  ;;  %v448_v37 = vld [vmem:[#allocation5 + $0x200] sm:$0xff] }
  0xee   : > { %v453_v31 = vld [vmem:[#allocation5 + $0x228] sm:$0xff]  ;;  %v452_v38 = vld [vmem:[#allocation5 + $0x220] sm:$0xff]  ;;  %2118 = vmatpush1.bf16.msra.mxu1 %v2117_v34 }
  0xef   : > { %v577_v32 = vld [vmem:[#allocation5 + $0x608] sm:$0xff]  ;;  %v2119_v36 = vpack.c.bf16 %v453_v31, %v449_v30  ;;  %v576_v39 = vld [vmem:[#allocation5 + $0x600] sm:$0xff]  ;;  %2180 = vmatprep.subr.bf16.mxu0 %v2179_v28  ;;  %v2121_v46 = vpack.c.bf16 %v452_v38, %v448_v37 }
  0xf0   : > { %v581_v33 = vld [vmem:[#allocation5 + $0x628] sm:$0xff]  ;;  %v580_v41 = vld [vmem:[#allocation5 + $0x620] sm:$0xff]  ;;  %2182 = vmatpush1.bf16.msra.mxu0 %v2181_v35 }
  0xf1   : > { %v2183_v40 = vpack.c.bf16 %v581_v33, %v577_v32  ;;  %v457_v42 = vld [vmem:[#allocation5 + $0x248] sm:$0xff]  ;;  %2120 = vmatprep.subr.bf16.mxu1 %v2119_v36  ;;  %v2185_v47 = vpack.c.bf16 %v580_v41, %v576_v39  ;;  %v456_v49 = vld [vmem:[#allocation5 + $0x240] sm:$0xff] }
  0xf2   : > { %v461_v43 = vld [vmem:[#allocation5 + $0x268] sm:$0xff]  ;;  %v460_v50 = vld [vmem:[#allocation5 + $0x260] sm:$0xff]  ;;  %2122 = vmatpush1.bf16.msra.mxu1 %v2121_v46 }
  0xf3   : > { %v585_v44 = vld [vmem:[#allocation5 + $0x648] sm:$0xff]  ;;  %v2123_v48 = vpack.c.bf16 %v461_v43, %v457_v42  ;;  %v584_v51 = vld [vmem:[#allocation5 + $0x640] sm:$0xff]  ;;  %2184 = vmatprep.subr.bf16.mxu0 %v2183_v40  ;;  %v2125_v58 = vpack.c.bf16 %v460_v50, %v456_v49 }
  0xf4   : > { %v589_v45 = vld [vmem:[#allocation5 + $0x668] sm:$0xff]  ;;  %v588_v53 = vld [vmem:[#allocation5 + $0x660] sm:$0xff]  ;;  %2186 = vmatpush1.bf16.msra.mxu0 %v2185_v47 }
  0xf5   : > { %v2187_v52 = vpack.c.bf16 %v589_v45, %v585_v44  ;;  %v465_v54 = vld [vmem:[#allocation5 + $0x288] sm:$0xff]  ;;  %2124 = vmatprep.subr.bf16.mxu1 %v2123_v48  ;;  %v2189_v59 = vpack.c.bf16 %v588_v53, %v584_v51  ;;  %v464_v61 = vld [vmem:[#allocation5 + $0x280] sm:$0xff] }
  0xf6   : > { %v469_v55 = vld [vmem:[#allocation5 + $0x2a8] sm:$0xff]  ;;  %v468_v62 = vld [vmem:[#allocation5 + $0x2a0] sm:$0xff]  ;;  %2126 = vmatpush1.bf16.msra.mxu1 %v2125_v58 }
  0xf7   : > { %v593_v56 = vld [vmem:[#allocation5 + $0x688] sm:$0xff]  ;;  %v2127_v60 = vpack.c.bf16 %v469_v55, %v465_v54  ;;  %v592_v63 = vld [vmem:[#allocation5 + $0x680] sm:$0xff]  ;;  %2188 = vmatprep.subr.bf16.mxu0 %v2187_v52  ;;  %v2129_v6 = vpack.c.bf16 %v468_v62, %v464_v61 }
  0xf8   : > { %v597_v57 = vld [vmem:[#allocation5 + $0x6a8] sm:$0xff]  ;;  %v596_v1 = vld [vmem:[#allocation5 + $0x6a0] sm:$0xff]  ;;  %2190 = vmatpush1.bf16.msra.mxu0 %v2189_v59 }
  0xf9   : > { %v2191_v0 = vpack.c.bf16 %v597_v57, %v593_v56  ;;  %v473_v2 = vld [vmem:[#allocation5 + $0x2c8] sm:$0xff]  ;;  %v472_v7 = vld [vmem:[#allocation5 + $0x2c0] sm:$0xff]  ;;  %2128 = vmatprep.subr.bf16.mxu1 %v2127_v60  ;;  %v2193_v8 = vpack.c.bf16 %v596_v1, %v592_v63  ;;  %v391_v1 = vld [vmem:[#allocation5 + $0x38] sm:$0xff] }
  0xfa   : > { %v477_v3 = vld [vmem:[#allocation5 + $0x2e8] sm:$0xff]  ;;  %v476_v10 = vld [vmem:[#allocation5 + $0x2e0] sm:$0xff]  ;;  %2130 = vmatpush1.bf16.msra.mxu1 %v2129_v6 }
  0xfb   : > { %v601_v4 = vld [vmem:[#allocation5 + $0x6c8] sm:$0xff]  ;;  %v2131_v9 = vpack.c.bf16 %v477_v3, %v473_v2  ;;  %v600_v11 = vld [vmem:[#allocation5 + $0x6c0] sm:$0xff]  ;;  %2192 = vmatprep.subr.bf16.mxu0 %v2191_v0  ;;  %v2133_v20 = vpack.c.bf16 %v476_v10, %v472_v7  ;;  %v387_v0 = vld [vmem:[#allocation5 + $0x18] sm:$0xff] }
  0xfc   : > { %v605_v5 = vld [vmem:[#allocation5 + $0x6e8] sm:$0xff]  ;;  %v604_v12 = vld [vmem:[#allocation5 + $0x6e0] sm:$0xff]  ;;  %2194 = vmatpush1.bf16.msra.mxu0 %v2193_v8  ;;  %v2343_v6 = vpack.c.bf16 %v391_v1, %v387_v0  ;;  %v386_v8 = vld [vmem:[#allocation5 + $0x10] sm:$0xff] }
  0xfd   : > { %v2195_v13 = vpack.c.bf16 %v605_v5, %v601_v4  ;;  %v481_v14 = vld [vmem:[#allocation5 + $0x308] sm:$0xff]  ;;  %2132 = vmatprep.subr.bf16.mxu1 %v2131_v9  ;;  %v2197_v21 = vpack.c.bf16 %v604_v12, %v600_v11  ;;  %v480_v23 = vld [vmem:[#allocation5 + $0x300] sm:$0xff]  ;;  %v390_v9 = vld [vmem:[#allocation5 + $0x30] sm:$0xff] }
  0xfe   : > { %v485_v15 = vld [vmem:[#allocation5 + $0x328] sm:$0xff]  ;;  %v484_v24 = vld [vmem:[#allocation5 + $0x320] sm:$0xff]  ;;  %2134 = vmatpush1.bf16.msra.mxu1 %v2133_v20  ;;  %v395_v12 = vld [vmem:[#allocation5 + $0x58] sm:$0xff]  ;;  %v2345_v20 = vpack.c.bf16 %v390_v9, %v386_v8 }
  0xff   : > { %v3504_v16 = vld [vmem:[%s3485_s22 + $0x8] sm:$0xff]  ;;  %v2135_v22 = vpack.c.bf16 %v485_v15, %v481_v14  ;;  %v608_v25 = vld [vmem:[#allocation5 + $0x700] sm:$0xff]  ;;  %2196 = vmatprep.subr.bf16.mxu0 %v2195_v13  ;;  %v2137_v32 = vpack.c.bf16 %v484_v24, %v480_v23  ;;  %v399_v13 = vld [vmem:[#allocation5 + $0x78] sm:$0xff] }
 0x100   : > { %v609_v17 = vld [vmem:[#allocation5 + $0x708] sm:$0xff]  ;;  %982 = vmatprep.mubr.f32.mxu1 %v3504_v16  ;;  %v612_v27 = vld [vmem:[#allocation5 + $0x720] sm:$0xff]  ;;  %2198 = vmatpush1.bf16.msra.mxu0 %v2197_v21  ;;  %v394_v24 = vld [vmem:[#allocation5 + $0x50] sm:$0xff] }
 0x101   : > { %v613_v18 = vld [vmem:[#allocation5 + $0x728] sm:$0xff]  ;;  %2136 = vmatprep.subr.bf16.mxu1 %v2135_v22  ;;  %v2201_v33 = vpack.c.bf16 %v612_v27, %v608_v25  ;;  %v488_v35 = vld [vmem:[#allocation5 + $0x340] sm:$0xff]  ;;  %v2347_v22 = vpack.c.bf16 %v399_v13, %v395_v12  ;;  %v398_v25 = vld [vmem:[#allocation5 + $0x70] sm:$0xff] }
 0x102   : > { %v2199_v26 = vpack.c.bf16 %v613_v18, %v609_v17  ;;  %v489_v28 = vld [vmem:[#allocation5 + $0x348] sm:$0xff]  ;;  %v492_v36 = vld [vmem:[#allocation5 + $0x360] sm:$0xff]  ;;  %2138 = vmatpush1.bf16.msra.mxu1 %v2137_v32  ;;  %v378_v18 = vld [vmem:[%s3485_s22 + $0x10] sm:$0xff]  ;;  %v2349_v32 = vpack.c.bf16 %v398_v25, %v394_v24 }
 0x103   : > { %v493_v29 = vld [vmem:[#allocation5 + $0x368] sm:$0xff]  ;;  %v616_v37 = vld [vmem:[#allocation5 + $0x740] sm:$0xff]  ;;  %v2141_v44 = vpack.c.bf16 %v492_v36, %v488_v35  ;;  %v402_v36 = vld [vmem:[#allocation5 + $0x90] sm:$0xff] }
 0x104   : > { %v617_v30 = vld [vmem:[#allocation5 + $0x748] sm:$0xff]  ;;  %v2139_v34 = vpack.c.bf16 %v493_v29, %v489_v28  ;;  %2200 = vmatprep.subr.bf16.mxu0 %v2199_v26  ;;  %v620_v39 = vld [vmem:[#allocation5 + $0x760] sm:$0xff]  ;;  %v403_v28 = vld [vmem:[#allocation5 + $0x98] sm:$0xff] }
 0x105   : > { %v621_v31 = vld [vmem:[#allocation5 + $0x768] sm:$0xff]  ;;  %2202 = vmatpush1.bf16.msra.mxu0 %v2201_v33  ;;  %v2205_v45 = vpack.c.bf16 %v620_v39, %v616_v37  ;;  %v496_v47 = vld [vmem:[#allocation5 + $0x380] sm:$0xff]  ;;  %v407_v29 = vld [vmem:[#allocation5 + $0xb8] sm:$0xff] }
 0x106   : > { %v2203_v38 = vpack.c.bf16 %v621_v31, %v617_v30  ;;  %v497_v40 = vld [vmem:[#allocation5 + $0x388] sm:$0xff]  ;;  %2140 = vmatprep.subr.bf16.mxu1 %v2139_v34  ;;  %v500_v48 = vld [vmem:[#allocation5 + $0x3a0] sm:$0xff]  ;;  %v2351_v34 = vpack.c.bf16 %v407_v29, %v403_v28  ;;  %v406_v37 = vld [vmem:[#allocation5 + $0xb0] sm:$0xff] }
 0x107   : > { %v501_v41 = vld [vmem:[#allocation5 + $0x3a8] sm:$0xff]  ;;  %v624_v49 = vld [vmem:[#allocation5 + $0x780] sm:$0xff]  ;;  %2142 = vmatpush1.bf16.msra.mxu1 %v2141_v44  ;;  %v2145_v56 = vpack.c.bf16 %v500_v48, %v496_v47  ;;  %v2353_v44 = vpack.c.bf16 %v406_v37, %v402_v36  ;;  %v410_v48 = vld [vmem:[#allocation5 + $0xd0] sm:$0xff] }
 0x108   : > { %v625_v42 = vld [vmem:[#allocation5 + $0x788] sm:$0xff]  ;;  %v2143_v46 = vpack.c.bf16 %v501_v41, %v497_v40  ;;  %2204 = vmatprep.subr.bf16.mxu0 %v2203_v38  ;;  %v628_v51 = vld [vmem:[#allocation5 + $0x7a0] sm:$0xff]  ;;  %v411_v40 = vld [vmem:[#allocation5 + $0xd8] sm:$0xff] }
 0x109   : > { %v629_v43 = vld [vmem:[#allocation5 + $0x7a8] sm:$0xff]  ;;  %2206 = vmatpush1.bf16.msra.mxu0 %v2205_v45  ;;  %v2209_v57 = vpack.c.bf16 %v628_v51, %v624_v49  ;;  %v504_v59 = vld [vmem:[#allocation5 + $0x3c0] sm:$0xff]  ;;  %v415_v41 = vld [vmem:[#allocation5 + $0xf8] sm:$0xff] }
 0x10a   : > { %v2207_v50 = vpack.c.bf16 %v629_v43, %v625_v42  ;;  %v505_v52 = vld [vmem:[#allocation5 + $0x3c8] sm:$0xff]  ;;  %2144 = vmatprep.subr.bf16.mxu1 %v2143_v46  ;;  %v508_v60 = vld [vmem:[#allocation5 + $0x3e0] sm:$0xff]  ;;  %v2355_v46 = vpack.c.bf16 %v415_v41, %v411_v40  ;;  %v414_v49 = vld [vmem:[#allocation5 + $0xf0] sm:$0xff] }
 0x10b   : > { %v509_v53 = vld [vmem:[#allocation5 + $0x3e8] sm:$0xff]  ;;  %v632_v61 = vld [vmem:[#allocation5 + $0x7c0] sm:$0xff]  ;;  %2146 = vmatpush1.bf16.msra.mxu1 %v2145_v56  ;;  %v2149_v4 = vpack.c.bf16 %v508_v60, %v504_v59  ;;  %v418_v59 = vld [vmem:[#allocation5 + $0x110] sm:$0xff] }
 0x10c   : > { %v633_v54 = vld [vmem:[#allocation5 + $0x7c8] sm:$0xff]  ;;  %v2147_v58 = vpack.c.bf16 %v509_v53, %v505_v52  ;;  %2208 = vmatprep.subr.bf16.mxu0 %v2207_v50  ;;  %v636_v63 = vld [vmem:[#allocation5 + $0x7e0] sm:$0xff]  ;;  %v419_v52 = vld [vmem:[#allocation5 + $0x118] sm:$0xff] }
 0x10d   : > { %v637_v55 = vld [vmem:[#allocation5 + $0x7e8] sm:$0xff]  ;;  %2210 = vmatpush1.bf16.msra.mxu0 %v2209_v57  ;;  %v2213_v5 = vpack.c.bf16 %v636_v63, %v632_v61  ;;  %v640_v7 = vld [vmem:[#allocation5 + $0x800] sm:$0xff]  ;;  %v423_v53 = vld [vmem:[#allocation5 + $0x138] sm:$0xff] }
 0x10e   : > { %v2211_v62 = vpack.c.bf16 %v637_v55, %v633_v54  ;;  %v641_v2 = vld [vmem:[#allocation5 + $0x808] sm:$0xff]  ;;  %2148 = vmatprep.subr.bf16.mxu1 %v2147_v58  ;;  %v644_v11 = vld [vmem:[#allocation5 + $0x820] sm:$0xff]  ;;  %v2359_v57 = vpack.c.bf16 %v423_v53, %v419_v52  ;;  %v422_v60 = vld [vmem:[#allocation5 + $0x130] sm:$0xff] }
 0x10f   : > { %v645_v3 = vld [vmem:[#allocation5 + $0x828] sm:$0xff]  ;;  %2150 = vmatpush1.bf16.msra.mxu1 %v2149_v4  ;;  %v3512_v17 = vld [vmem:[%s3485_s22] sm:$0xff]  ;;  %v2217_v21 = vpack.c.bf16 %v644_v11, %v640_v7  ;;  %v427_v63 = vld [vmem:[#allocation5 + $0x158] sm:$0xff] }
 0x110   : > { %2212 = vmatprep.subr.bf16.mxu0 %v2211_v62  ;;  %v2215_v10 = vpack.c.bf16 %v645_v3, %v641_v2  ;;  %v649_v14 = vld [vmem:[#allocation5 + $0x848] sm:$0xff]  ;;  %2344 = vmatprep.subr.bf16.mxu1 %v2343_v6  ;;  %v648_v23 = vld [vmem:[#allocation5 + $0x840] sm:$0xff]  ;;  %v431_v0 = vld [vmem:[#allocation5 + $0x178] sm:$0xff]  ;;  %v2361_v3 = vpack.c.bf16 %v422_v60, %v418_v59 }
 0x111   : > { %v653_v15 = vld [vmem:[#allocation5 + $0x868] sm:$0xff]  ;;  %2214 = vmatpush1.bf16.msra.mxu0 %v2213_v5  ;;  %v652_v27 = vld [vmem:[#allocation5 + $0x860] sm:$0xff]  ;;  %v2363_v5 = vpack.c.bf16 %v431_v0, %v427_v63  ;;  %v426_v7 = vld [vmem:[#allocation5 + $0x150] sm:$0xff] }
 0x112   : > { %2216 = vmatprep.subr.bf16.mxu0 %v2215_v10  ;;  %v2219_v26 = vpack.c.bf16 %v653_v15, %v649_v14  ;;  %983 = vmatmul.mubr.f32.vlgmr.msra.gmra.mrb[0].mxu1 %v3512_v17  ;;  %v657_v30 = vld [vmem:[#allocation5 + $0x888] sm:$0xff]  ;;  %v2221_v33 = vpack.c.bf16 %v652_v27, %v648_v23  ;;  %v656_v35 = vld [vmem:[#allocation5 + $0x880] sm:$0xff]  ;;  %v430_v8 = vld [vmem:[#allocation5 + $0x170] sm:$0xff] }
 0x113   : > { %v661_v31 = vld [vmem:[#allocation5 + $0x8a8] sm:$0xff]  ;;  %2346 = vmatpush1.bf16.msra.mxu1 %v2345_v20  ;;  %v660_v39 = vld [vmem:[#allocation5 + $0x8a0] sm:$0xff]  ;;  %1266 = vmatprep.mubr.f32.mxu1 %v3504_v16  ;;  %v2357_v16 = vpack.c.bf16 %v414_v49, %v410_v48  ;;  %v435_v11 = vld [vmem:[#allocation5 + $0x198] sm:$0xff]  ;;  %v2365_v15 = vpack.c.bf16 %v430_v8, %v426_v7 }
 0x114   : > { %1054 = vmatmul.mubr.f32.vlgmr.msra.gmra.mrb[0].mxu0 %v378_v18  ;;  %2348 = vmatprep.subr.bf16.mxu1 %v2347_v22  ;;  %v2223_v38 = vpack.c.bf16 %v661_v31, %v657_v30  ;;  %v665_v42 = vld [vmem:[#allocation5 + $0x8c8] sm:$0xff]  ;;  %v2225_v45 = vpack.c.bf16 %v660_v39, %v656_v35  ;;  %v664_v47 = vld [vmem:[#allocation5 + $0x8c0] sm:$0xff]  ;;  %v439_v12 = vld [vmem:[#allocation5 + $0x1b8] sm:$0xff] }
 0x115   : > { %2218 = vmatpush1.bf16.msra.mxu0 %v2217_v21  ;;  %v669_v43 = vld [vmem:[#allocation5 + $0x8e8] sm:$0xff]  ;;  %v668_v51 = vld [vmem:[#allocation5 + $0x8e0] sm:$0xff]  ;;  %v2367_v21 = vpack.c.bf16 %v439_v12, %v435_v11  ;;  %v434_v23 = vld [vmem:[#allocation5 + $0x190] sm:$0xff] }
 0x116   : > { %2220 = vmatprep.subr.bf16.mxu0 %v2219_v26  ;;  %v2227_v50 = vpack.c.bf16 %v669_v43, %v665_v42  ;;  %v673_v54 = vld [vmem:[#allocation5 + $0x908] sm:$0xff]  ;;  %v2229_v56 = vpack.c.bf16 %v668_v51, %v664_v47  ;;  %v672_v58 = vld [vmem:[#allocation5 + $0x900] sm:$0xff]  ;;  %v438_v24 = vld [vmem:[#allocation5 + $0x1b0] sm:$0xff] }
 0x117   : > { %2350 = vmatpush1.bf16.msra.mxu1 %v2349_v32  ;;  %v677_v55 = vld [vmem:[#allocation5 + $0x928] sm:$0xff]  ;;  %v676_v62 = vld [vmem:[#allocation5 + $0x920] sm:$0xff]  ;;  %v443_v26 = vld [vmem:[#allocation5 + $0x1d8] sm:$0xff]  ;;  %v2369_v31 = vpack.c.bf16 %v438_v24, %v434_v23 }
 0x118   : > { %2352 = vmatprep.subr.bf16.mxu1 %v2351_v34  ;;  %v2231_v61 = vpack.c.bf16 %v677_v55, %v673_v54  ;;  %v681_v1 = vld [vmem:[#allocation5 + $0x948] sm:$0xff]  ;;  %v2233_v4 = vpack.c.bf16 %v676_v62, %v672_v58  ;;  %v680_v6 = vld [vmem:[#allocation5 + $0x940] sm:$0xff]  ;;  %v447_v27 = vld [vmem:[#allocation5 + $0x1f8] sm:$0xff] }
 0x119   : > { %2222 = vmatpush1.bf16.msra.mxu0 %v2221_v33  ;;  %v685_v2 = vld [vmem:[#allocation5 + $0x968] sm:$0xff]  ;;  %v684_v10 = vld [vmem:[#allocation5 + $0x960] sm:$0xff]  ;;  %v2371_v33 = vpack.c.bf16 %v447_v27, %v443_v26  ;;  %v442_v35 = vld [vmem:[#allocation5 + $0x1d0] sm:$0xff] }
 0x11a   : > { %2224 = vmatprep.subr.bf16.mxu0 %v2223_v38  ;;  %v2235_v9 = vpack.c.bf16 %v685_v2, %v681_v1  ;;  %v689_v13 = vld [vmem:[#allocation5 + $0x988] sm:$0xff]  ;;  %v688_v18 = vld [vmem:[#allocation5 + $0x980] sm:$0xff]  ;;  %v2237_v20 = vpack.c.bf16 %v684_v10, %v680_v6  ;;  %v446_v36 = vld [vmem:[#allocation5 + $0x1f0] sm:$0xff] }
 0x11b   : > { %2354 = vmatpush1.bf16.msra.mxu1 %v2353_v44  ;;  %v693_v14 = vld [vmem:[#allocation5 + $0x9a8] sm:$0xff]  ;;  %v692_v22 = vld [vmem:[#allocation5 + $0x9a0] sm:$0xff]  ;;  %v451_v39 = vld [vmem:[#allocation5 + $0x218] sm:$0xff]  ;;  %v2373_v43 = vpack.c.bf16 %v446_v36, %v442_v35 }
 0x11c   : > { %2356 = vmatprep.subr.bf16.mxu1 %v2355_v46  ;;  %v2239_v25 = vpack.c.bf16 %v693_v14, %v689_v13  ;;  %v3518_v28 = vld [vmem:[%s3485_s22 + $0x28] sm:$0xff]  ;;  %v2241_v32 = vpack.c.bf16 %v692_v22, %v688_v18  ;;  %v696_v34 = vld [vmem:[#allocation5 + $0x9c0] sm:$0xff]  ;;  %v455_v40 = vld [vmem:[#allocation5 + $0x238] sm:$0xff] }
 0x11d   : > { %2226 = vmatpush1.bf16.msra.mxu0 %v2225_v45  ;;  %v697_v29 = vld [vmem:[#allocation5 + $0x9c8] sm:$0xff]  ;;  %1124 = vmatprep.mubr.f32.mxu0 %v3518_v28  ;;  %v700_v38 = vld [vmem:[#allocation5 + $0x9e0] sm:$0xff]  ;;  %v2375_v45 = vpack.c.bf16 %v455_v40, %v451_v39  ;;  %v450_v47 = vld [vmem:[#allocation5 + $0x210] sm:$0xff] }
 0x11e   : > { %2228 = vmatprep.subr.bf16.mxu0 %v2227_v50  ;;  %v701_v30 = vld [vmem:[#allocation5 + $0x9e8] sm:$0xff]  ;;  %v2245_v44 = vpack.c.bf16 %v700_v38, %v696_v34  ;;  %v704_v46 = vld [vmem:[#allocation5 + $0xa00] sm:$0xff]  ;;  %v454_v48 = vld [vmem:[#allocation5 + $0x230] sm:$0xff] }
 0x11f   : > { %2358 = vmatpush1.bf16.msra.mxu1 %v2357_v16  ;;  %v2243_v37 = vpack.c.bf16 %v701_v30, %v697_v29  ;;  %v705_v41 = vld [vmem:[#allocation5 + $0xa08] sm:$0xff]  ;;  %v708_v50 = vld [vmem:[#allocation5 + $0xa20] sm:$0xff]  ;;  %v459_v51 = vld [vmem:[#allocation5 + $0x258] sm:$0xff]  ;;  %v2377_v55 = vpack.c.bf16 %v454_v48, %v450_v47 }
 0x120   : > { %2360 = vmatprep.subr.bf16.mxu1 %v2359_v57  ;;  %v709_v42 = vld [vmem:[#allocation5 + $0xa28] sm:$0xff]  ;;  %v463_v52 = vld [vmem:[#allocation5 + $0x278] sm:$0xff]  ;;  %v2249_v16 = vpack.c.bf16 %v708_v50, %v704_v46  ;;  %v712_v57 = vld [vmem:[#allocation5 + $0xa40] sm:$0xff] }
 0x121   : > { %2230 = vmatpush1.bf16.msra.mxu0 %v2229_v56  ;;  %v2247_v49 = vpack.c.bf16 %v709_v42, %v705_v41  ;;  %v713_v53 = vld [vmem:[#allocation5 + $0xa48] sm:$0xff]  ;;  %v2379_v56 = vpack.c.bf16 %v463_v52, %v459_v51  ;;  %v458_v58 = vld [vmem:[#allocation5 + $0x250] sm:$0xff]  ;;  %v467_v62 = vld [vmem:[#allocation5 + $0x298] sm:$0xff] }
 0x122   : > { %2232 = vmatprep.subr.bf16.mxu0 %v2231_v61  ;;  %v717_v54 = vld [vmem:[#allocation5 + $0xa68] sm:$0xff]  ;;  %v462_v59 = vld [vmem:[#allocation5 + $0x270] sm:$0xff]  ;;  %v716_v61 = vld [vmem:[#allocation5 + $0xa60] sm:$0xff] }
 0x123   : > { %2362 = vmatpush1.bf16.msra.mxu1 %v2361_v3  ;;  %v2251_v60 = vpack.c.bf16 %v717_v54, %v713_v53  ;;  %v471_v63 = vld [vmem:[#allocation5 + $0x2b8] sm:$0xff]  ;;  %v721_v0 = vld [vmem:[#allocation5 + $0xa88] sm:$0xff]  ;;  %v2381_v2 = vpack.c.bf16 %v462_v59, %v458_v58  ;;  %v2253_v3 = vpack.c.bf16 %v716_v61, %v712_v57  ;;  %v466_v6 = vld [vmem:[#allocation5 + $0x290] sm:$0xff] }
 0x124   : > { %2364 = vmatprep.subr.bf16.mxu1 %v2363_v5  ;;  %v725_v1 = vld [vmem:[#allocation5 + $0xaa8] sm:$0xff]  ;;  %v720_v5 = vld [vmem:[#allocation5 + $0xa80] sm:$0xff]  ;;  %v470_v7 = vld [vmem:[#allocation5 + $0x2b0] sm:$0xff] }
 0x125   : > { %2234 = vmatpush1.bf16.msra.mxu0 %v2233_v4  ;;  %v2383_v4 = vpack.c.bf16 %v471_v63, %v467_v62  ;;  %v2255_v8 = vpack.c.bf16 %v725_v1, %v721_v0  ;;  %v475_v10 = vld [vmem:[#allocation5 + $0x2d8] sm:$0xff]  ;;  %v729_v12 = vld [vmem:[#allocation5 + $0xac8] sm:$0xff]  ;;  %v2385_v14 = vpack.c.bf16 %v470_v7, %v466_v6  ;;  %v478_v22 = vld [vmem:[#allocation5 + $0x2f0] sm:$0xff] }
 0x126   : > { %2236 = vmatprep.subr.bf16.mxu0 %v2235_v9  ;;  %v724_v9 = vld [vmem:[#allocation5 + $0xaa0] sm:$0xff]  ;;  %v479_v11 = vld [vmem:[#allocation5 + $0x2f8] sm:$0xff]  ;;  %v733_v13 = vld [vmem:[#allocation5 + $0xae8] sm:$0xff] }
 0x127   : > { %2366 = vmatpush1.bf16.msra.mxu1 %v2365_v15  ;;  %v2257_v15 = vpack.c.bf16 %v724_v9, %v720_v5  ;;  %v2387_v18 = vpack.c.bf16 %v479_v11, %v475_v10  ;;  %v2259_v23 = vpack.c.bf16 %v733_v13, %v729_v12  ;;  %v732_v24 = vld [vmem:[#allocation5 + $0xae0] sm:$0xff]  ;;  %v487_v26 = vld [vmem:[#allocation5 + $0x338] sm:$0xff]  ;;  %v737_v27 = vld [vmem:[#allocation5 + $0xb08] sm:$0xff] }
 0x128   : > { %2368 = vmatprep.subr.bf16.mxu1 %v2367_v21  ;;  %v474_v21 = vld [vmem:[#allocation5 + $0x2d0] sm:$0xff]  ;;  %v741_v29 = vld [vmem:[#allocation5 + $0xb28] sm:$0xff]  ;;  %v491_v38 = vld [vmem:[#allocation5 + $0x358] sm:$0xff] }
 0x129   : > { %2238 = vmatpush1.bf16.msra.mxu0 %v2237_v20  ;;  %v728_v20 = vld [vmem:[#allocation5 + $0xac0] sm:$0xff]  ;;  %v2389_v30 = vpack.c.bf16 %v478_v22, %v474_v21  ;;  %v482_v34 = vld [vmem:[#allocation5 + $0x310] sm:$0xff]  ;;  %v2263_v36 = vpack.c.bf16 %v741_v29, %v737_v27  ;;  %v495_v39 = vld [vmem:[#allocation5 + $0x378] sm:$0xff] }
 0x12a   : > { %2240 = vmatprep.subr.bf16.mxu0 %v2239_v25  ;;  %v483_v25 = vld [vmem:[#allocation5 + $0x318] sm:$0xff]  ;;  %v486_v35 = vld [vmem:[#allocation5 + $0x330] sm:$0xff]  ;;  %v745_v40 = vld [vmem:[#allocation5 + $0xb48] sm:$0xff] }
 0x12b   : > { %2370 = vmatpush1.bf16.msra.mxu1 %v2369_v31  ;;  %v2261_v31 = vpack.c.bf16 %v732_v24, %v728_v20  ;;  %v749_v41 = vld [vmem:[#allocation5 + $0xb68] sm:$0xff]  ;;  %v2393_v42 = vpack.c.bf16 %v486_v35, %v482_v34  ;;  %v490_v46 = vld [vmem:[#allocation5 + $0x350] sm:$0xff]  ;;  %v499_v50 = vld [vmem:[#allocation5 + $0x398] sm:$0xff] }
 0x12c   : > { %2372 = vmatprep.subr.bf16.mxu1 %v2371_v33  ;;  %v736_v33 = vld [vmem:[#allocation5 + $0xb00] sm:$0xff]  ;;  %v494_v47 = vld [vmem:[#allocation5 + $0x370] sm:$0xff]  ;;  %v2267_v48 = vpack.c.bf16 %v749_v41, %v745_v40  ;;  %v503_v51 = vld [vmem:[#allocation5 + $0x3b8] sm:$0xff] }
 0x12d   : > { %2242 = vmatpush1.bf16.msra.mxu0 %v2241_v32  ;;  %v2391_v32 = vpack.c.bf16 %v487_v26, %v483_v25  ;;  %v753_v52 = vld [vmem:[#allocation5 + $0xb88] sm:$0xff]  ;;  %v2397_v54 = vpack.c.bf16 %v494_v47, %v490_v46  ;;  %v498_v57 = vld [vmem:[#allocation5 + $0x390] sm:$0xff]  ;;  %v507_v61 = vld [vmem:[#allocation5 + $0x3d8] sm:$0xff] }
 0x12e   : > { %2244 = vmatprep.subr.bf16.mxu0 %v2243_v37  ;;  %v740_v37 = vld [vmem:[#allocation5 + $0xb20] sm:$0xff]  ;;  %v757_v53 = vld [vmem:[#allocation5 + $0xba8] sm:$0xff]  ;;  %v502_v58 = vld [vmem:[#allocation5 + $0x3b0] sm:$0xff] }
 0x12f   : > { %2374 = vmatpush1.bf16.msra.mxu1 %v2373_v43  ;;  %v2265_v43 = vpack.c.bf16 %v740_v37, %v736_v33  ;;  %v2271_v59 = vpack.c.bf16 %v757_v53, %v753_v52  ;;  %v511_v62 = vld [vmem:[#allocation5 + $0x3f8] sm:$0xff]  ;;  %v761_v63 = vld [vmem:[#allocation5 + $0xbc8] sm:$0xff]  ;;  %v2401_v1 = vpack.c.bf16 %v502_v58, %v498_v57  ;;  %v506_v5 = vld [vmem:[#allocation5 + $0x3d0] sm:$0xff] }
 0x130   : > { %2376 = vmatprep.subr.bf16.mxu1 %v2375_v45  ;;  %v744_v45 = vld [vmem:[#allocation5 + $0xb40] sm:$0xff]  ;;  %v765_v0 = vld [vmem:[#allocation5 + $0xbe8] sm:$0xff]  ;;  %v510_v6 = vld [vmem:[#allocation5 + $0x3f0] sm:$0xff] }
 0x131   : > { %2246 = vmatpush1.bf16.msra.mxu0 %v2245_v44  ;;  %v2395_v44 = vpack.c.bf16 %v495_v39, %v491_v38  ;;  %v2275_v7 = vpack.c.bf16 %v765_v0, %v761_v63  ;;  %v515_v9 = vld [vmem:[#allocation5 + $0x418] sm:$0xff]  ;;  %v769_v11 = vld [vmem:[#allocation5 + $0xc08] sm:$0xff]  ;;  %v2405_v13 = vpack.c.bf16 %v510_v6, %v506_v5  ;;  %v514_v20 = vld [vmem:[#allocation5 + $0x410] sm:$0xff] }
 0x132   : > { %2248 = vmatprep.subr.bf16.mxu0 %v2247_v49  ;;  %v748_v49 = vld [vmem:[#allocation5 + $0xb60] sm:$0xff]  ;;  %v519_v10 = vld [vmem:[#allocation5 + $0x438] sm:$0xff]  ;;  %v773_v12 = vld [vmem:[#allocation5 + $0xc28] sm:$0xff] }
 0x133   : > { %2378 = vmatpush1.bf16.msra.mxu1 %v2377_v55  ;;  %v2269_v55 = vpack.c.bf16 %v748_v49, %v744_v45  ;;  %v518_v21 = vld [vmem:[#allocation5 + $0x430] sm:$0xff]  ;;  %v2279_v22 = vpack.c.bf16 %v773_v12, %v769_v11  ;;  %v523_v24 = vld [vmem:[#allocation5 + $0x458] sm:$0xff]  ;;  %v777_v26 = vld [vmem:[#allocation5 + $0xc48] sm:$0xff] }
 0x134   : > { %2380 = vmatprep.subr.bf16.mxu1 %v2379_v56  ;;  %v752_v56 = vld [vmem:[#allocation5 + $0xb80] sm:$0xff]  ;;  %v527_v25 = vld [vmem:[#allocation5 + $0x478] sm:$0xff]  ;;  %v781_v27 = vld [vmem:[#allocation5 + $0xc68] sm:$0xff] }
 0x135   : > { %2250 = vmatpush1.bf16.msra.mxu0 %v2249_v16  ;;  %v2399_v16 = vpack.c.bf16 %v503_v51, %v499_v50  ;;  %v3522_v29 = vld [vmem:[%s3485_s22 + $0x20] sm:$0xff]  ;;  %v522_v34 = vld [vmem:[#allocation5 + $0x450] sm:$0xff]  ;;  %v531_v38 = vld [vmem:[#allocation5 + $0x498] sm:$0xff] }
 0x136   : > { %2252 = vmatprep.subr.bf16.mxu0 %v2251_v60  ;;  %v756_v60 = vld [vmem:[#allocation5 + $0xba0] sm:$0xff]  ;;  %v526_v35 = vld [vmem:[#allocation5 + $0x470] sm:$0xff]  ;;  %v535_v39 = vld [vmem:[#allocation5 + $0x4b8] sm:$0xff] }
 0x137   : > { %2382 = vmatpush1.bf16.msra.mxu1 %v2381_v2  ;;  %v2273_v2 = vpack.c.bf16 %v756_v60, %v752_v56  ;;  %v776_v33 = vld [vmem:[#allocation5 + $0xc40] sm:$0xff]  ;;  %v785_v40 = vld [vmem:[#allocation5 + $0xc88] sm:$0xff]  ;;  %v2415_v45 = vpack.c.bf16 %v535_v39, %v531_v38  ;;  %v530_v47 = vld [vmem:[#allocation5 + $0x490] sm:$0xff] }
 0x138   : > { %2384 = vmatprep.subr.bf16.mxu1 %v2383_v4  ;;  %v760_v4 = vld [vmem:[#allocation5 + $0xbc0] sm:$0xff]  ;;  %v789_v41 = vld [vmem:[#allocation5 + $0xca8] sm:$0xff]  ;;  %v539_v51 = vld [vmem:[#allocation5 + $0x4d8] sm:$0xff] }
 0x139   : > { %2254 = vmatpush1.bf16.msra.mxu0 %v2253_v3  ;;  %v2403_v3 = vpack.c.bf16 %v511_v62, %v507_v61  ;;  %v780_v37 = vld [vmem:[#allocation5 + $0xc60] sm:$0xff]  ;;  %v2287_v49 = vpack.c.bf16 %v789_v41, %v785_v40  ;;  %v793_v52 = vld [vmem:[#allocation5 + $0xcc8] sm:$0xff]  ;;  %v538_v57 = vld [vmem:[#allocation5 + $0x4d0] sm:$0xff] }
 0x13a   : > { %2256 = vmatprep.subr.bf16.mxu0 %v2255_v8  ;;  %v764_v8 = vld [vmem:[#allocation5 + $0xbe0] sm:$0xff]  ;;  %v797_v53 = vld [vmem:[#allocation5 + $0xce8] sm:$0xff]  ;;  %v542_v58 = vld [vmem:[#allocation5 + $0x4f0] sm:$0xff] }
 0x13b   : > { %2386 = vmatpush1.bf16.msra.mxu1 %v2385_v14  ;;  %v2277_v14 = vpack.c.bf16 %v764_v8, %v760_v4  ;;  %v784_v46 = vld [vmem:[#allocation5 + $0xc80] sm:$0xff]  ;;  %v547_v61 = vld [vmem:[#allocation5 + $0x518] sm:$0xff]  ;;  %v801_v63 = vld [vmem:[#allocation5 + $0xd08] sm:$0xff] }
 0x13c   : > { %2388 = vmatprep.subr.bf16.mxu1 %v2387_v18  ;;  %v768_v18 = vld [vmem:[#allocation5 + $0xc00] sm:$0xff]  ;;  %v551_v62 = vld [vmem:[#allocation5 + $0x538] sm:$0xff]  ;;  %v805_v0 = vld [vmem:[#allocation5 + $0xd28] sm:$0xff] }
 0x13d   : > { %2258 = vmatpush1.bf16.msra.mxu0 %v2257_v15  ;;  %v2407_v15 = vpack.c.bf16 %v519_v10, %v515_v9  ;;  %v788_v50 = vld [vmem:[#allocation5 + $0xca0] sm:$0xff]  ;;  %v546_v4 = vld [vmem:[#allocation5 + $0x510] sm:$0xff]  ;;  %v2295_v6 = vpack.c.bf16 %v805_v0, %v801_v63  ;;  %v555_v8 = vld [vmem:[#allocation5 + $0x558] sm:$0xff] }
 0x13e   : > { %2260 = vmatprep.subr.bf16.mxu0 %v2259_v23  ;;  %v772_v23 = vld [vmem:[#allocation5 + $0xc20] sm:$0xff]  ;;  %v550_v5 = vld [vmem:[#allocation5 + $0x530] sm:$0xff]  ;;  %v559_v9 = vld [vmem:[#allocation5 + $0x578] sm:$0xff] }
 0x13f   : > { %2390 = vmatpush1.bf16.msra.mxu1 %v2389_v30  ;;  %v2409_v30 = vpack.c.bf16 %v518_v21, %v514_v20  ;;  %v792_v56 = vld [vmem:[#allocation5 + $0xcc0] sm:$0xff]  ;;  %v809_v10 = vld [vmem:[#allocation5 + $0xd48] sm:$0xff]  ;;  %v2425_v12 = vpack.c.bf16 %v550_v5, %v546_v4  ;;  %v558_v20 = vld [vmem:[#allocation5 + $0x570] sm:$0xff] }
 0x140   : > { %2392 = vmatprep.subr.bf16.mxu1 %v2391_v32  ;;  %v2411_v32 = vpack.c.bf16 %v527_v25, %v523_v24  ;;  %v796_v60 = vld [vmem:[#allocation5 + $0xce0] sm:$0xff]  ;;  %v813_v11 = vld [vmem:[#allocation5 + $0xd68] sm:$0xff]  ;;  %v567_v24 = vld [vmem:[#allocation5 + $0x5b8] sm:$0xff] }
 0x141   : > { %2262 = vmatpush1.bf16.msra.mxu0 %v2261_v31  ;;  %v2281_v31 = vpack.c.bf16 %v772_v23, %v768_v18  ;;  %v554_v18 = vld [vmem:[#allocation5 + $0x550] sm:$0xff]  ;;  %v2299_v21 = vpack.c.bf16 %v813_v11, %v809_v10  ;;  %v563_v23 = vld [vmem:[#allocation5 + $0x598] sm:$0xff]  ;;  %v817_v25 = vld [vmem:[#allocation5 + $0xd88] sm:$0xff] }
 0x142   : > { %2264 = vmatprep.subr.bf16.mxu0 %v2263_v36  ;;  %v2283_v36 = vpack.c.bf16 %v781_v27, %v777_v26  ;;  %v821_v26 = vld [vmem:[#allocation5 + $0xda8] sm:$0xff]  ;;  %v2429_v27 = vpack.c.bf16 %v558_v20, %v554_v18  ;;  %v575_v38 = vld [vmem:[#allocation5 + $0x5f8] sm:$0xff]  ;;  %v590_v4 = vld [vmem:[#allocation5 + $0x670] sm:$0xff] }
 0x143   : > { %2394 = vmatpush1.bf16.msra.mxu1 %v2393_v42  ;;  %v3526_v42 = vld [vmem:[%s3485_s22 + $0x38] sm:$0xff]  ;;  %v825_v39 = vld [vmem:[#allocation5 + $0xdc8] sm:$0xff]  ;;  %v598_v18 = vld [vmem:[#allocation5 + $0x6b0] sm:$0xff] }
 0x144   : > { %2396 = vmatprep.subr.bf16.mxu1 %v2395_v44  ;;  %v2285_v44 = vpack.c.bf16 %v780_v37, %v776_v33  ;;  %v562_v33 = vld [vmem:[#allocation5 + $0x590] sm:$0xff]  ;;  %v571_v37 = vld [vmem:[#allocation5 + $0x5d8] sm:$0xff]  ;;  %v829_v40 = vld [vmem:[#allocation5 + $0xde8] sm:$0xff] }
 0x145   : > { %2266 = vmatpush1.bf16.msra.mxu0 %v2265_v43  ;;  %v2413_v43 = vpack.c.bf16 %v526_v35, %v522_v34  ;;  %v566_v34 = vld [vmem:[#allocation5 + $0x5b0] sm:$0xff]  ;;  %v2303_v35 = vpack.c.bf16 %v821_v26, %v817_v25  ;;  %v845_v63 = vld [vmem:[#allocation5 + $0xe68] sm:$0xff] }
 0x146   : > { %2268 = vmatprep.subr.bf16.mxu0 %v2267_v48  ;;  %v534_v48 = vld [vmem:[#allocation5 + $0x4b0] sm:$0xff]  ;;  %v2433_v41 = vpack.c.bf16 %v566_v34, %v562_v33  ;;  %v853_v10 = vld [vmem:[#allocation5 + $0xea8] sm:$0xff] }
 0x147   : > { %2398 = vmatpush1.bf16.msra.mxu1 %v2397_v54  ;;  %v2417_v54 = vpack.c.bf16 %v534_v48, %v530_v47  ;;  %v574_v47 = vld [vmem:[#allocation5 + $0x5f0] sm:$0xff]  ;;  %v2307_v48 = vpack.c.bf16 %v829_v40, %v825_v39  ;;  %v861_v25 = vld [vmem:[#allocation5 + $0xee8] sm:$0xff] }
 0x148   : > { %2400 = vmatprep.subr.bf16.mxu1 %v2399_v16  ;;  %v606_v33 = vld [vmem:[#allocation5 + $0x6f0] sm:$0xff]  ;;  %v869_v39 = vld [vmem:[#allocation5 + $0xf28] sm:$0xff] }
 0x149   : > { %2270 = vmatpush1.bf16.msra.mxu0 %v2269_v55  ;;  %v2289_v55 = vpack.c.bf16 %v788_v50, %v784_v46  ;;  %v570_v46 = vld [vmem:[#allocation5 + $0x5d0] sm:$0xff]  ;;  %v579_v50 = vld [vmem:[#allocation5 + $0x618] sm:$0xff] }
 0x14a   : > { %2272 = vmatprep.subr.bf16.mxu0 %v2271_v59  ;;  %v2291_v59 = vpack.c.bf16 %v797_v53, %v793_v52  ;;  %v837_v52 = vld [vmem:[#allocation5 + $0xe28] sm:$0xff]  ;;  %v2437_v53 = vpack.c.bf16 %v574_v47, %v570_v46  ;;  %v614_v46 = vld [vmem:[#allocation5 + $0x730] sm:$0xff] }
 0x14b   : > { %2402 = vmatpush1.bf16.msra.mxu1 %v2401_v1  ;;  %v2421_v1 = vpack.c.bf16 %v542_v58, %v538_v57  ;;  %v582_v57 = vld [vmem:[#allocation5 + $0x630] sm:$0xff] }
 0x14c   : > { %2404 = vmatprep.subr.bf16.mxu1 %v2403_v3  ;;  %v800_v3 = vld [vmem:[#allocation5 + $0xd00] sm:$0xff] }
 0x14d   : > { %2274 = vmatpush1.bf16.msra.mxu0 %v2273_v2  ;;  %v2423_v2 = vpack.c.bf16 %v551_v62, %v547_v61  ;;  %v591_v61 = vld [vmem:[#allocation5 + $0x678] sm:$0xff]  ;;  %v841_v62 = vld [vmem:[#allocation5 + $0xe48] sm:$0xff] }
 0x14e   : > { %2276 = vmatprep.subr.bf16.mxu0 %v2275_v7  ;;  %v804_v7 = vld [vmem:[#allocation5 + $0xd20] sm:$0xff]  ;;  %v2315_v5 = vpack.c.bf16 %v845_v63, %v841_v62  ;;  %v885_v62 = vld [vmem:[#allocation5 + $0xfa8] sm:$0xff] }
 0x14f   : > { %2406 = vmatpush1.bf16.msra.mxu1 %v2405_v13  ;;  %v2297_v13 = vpack.c.bf16 %v804_v7, %v800_v3  ;;  %v586_v3 = vld [vmem:[#allocation5 + $0x650] sm:$0xff]  ;;  %v595_v7 = vld [vmem:[#allocation5 + $0x698] sm:$0xff] }
 0x150   : > { %2408 = vmatprep.subr.bf16.mxu1 %v2407_v15  ;;  %v808_v15 = vld [vmem:[#allocation5 + $0xd40] sm:$0xff]  ;;  %v2445_v11 = vpack.c.bf16 %v590_v4, %v586_v3  ;;  %v630_v3 = vld [vmem:[#allocation5 + $0x7b0] sm:$0xff] }
 0x151   : > { %2278 = vmatpush1.bf16.msra.mxu0 %v2277_v14  ;;  %v2427_v14 = vpack.c.bf16 %v559_v9, %v555_v8  ;;  %v599_v8 = vld [vmem:[#allocation5 + $0x6b8] sm:$0xff]  ;;  %v849_v9 = vld [vmem:[#allocation5 + $0xe88] sm:$0xff] }
 0x152   : > { %2280 = vmatprep.subr.bf16.mxu0 %v2279_v22  ;;  %1267 = vmatmul.mubr.f32.vlgmr.msra.gmra.mrb[2].mxu1 %v3512_v17  ;;  %v543_v17 = vld [vmem:[#allocation5 + $0x4f8] sm:$0xff]  ;;  %v812_v22 = vld [vmem:[#allocation5 + $0xd60] sm:$0xff]  ;;  %v2319_v20 = vpack.c.bf16 %v853_v10, %v849_v9  ;;  %v893_v9 = vld [vmem:[#allocation5 + $0xfe8] sm:$0xff] }
 0x153   : > { %2410 = vmatpush1.bf16.msra.mxu1 %v2409_v30  ;;  %1337 = vmatprep.mubr.f32.mxu1 %v3508_v19  ;;  %v2419_v16 = vpack.c.bf16 %v543_v17, %v539_v51  ;;  %v2293_v19 = vpack.c.bf16 %v796_v60, %v792_v56  ;;  %v2301_v30 = vpack.c.bf16 %v812_v22, %v808_v15  ;;  %v583_v51 = vld [vmem:[#allocation5 + $0x638] sm:$0xff]  ;;  %v833_v17 = vld [vmem:[#allocation5 + $0xe08] sm:$0xff]  ;;  %v578_v56 = vld [vmem:[#allocation5 + $0x610] sm:$0xff] }
 0x154   : > { %1125 = vmatmul.mubr.f32.vlgmr.msra.gmra.mrb[0].mxu0 %v3522_v29  ;;  %2412 = vmatprep.subr.bf16.mxu1 %v2411_v32  ;;  %v816_v32 = vld [vmem:[#allocation5 + $0xd80] sm:$0xff]  ;;  %v2311_v58 = vpack.c.bf16 %v837_v52, %v833_v17  ;;  %v587_v60 = vld [vmem:[#allocation5 + $0x658] sm:$0xff]  ;;  %v2441_v0 = vpack.c.bf16 %v582_v57, %v578_v56  ;;  %v594_v15 = vld [vmem:[#allocation5 + $0x690] sm:$0xff] }
 0x155   : > { %2282 = vmatpush1.bf16.msra.mxu0 %v2281_v31  ;;  %1195 = vmatprep.mubr.f32.mxu0 %v3526_v42  ;;  %v2431_v31 = vpack.c.bf16 %v567_v24, %v563_v23  ;;  %v603_v22 = vld [vmem:[#allocation5 + $0x6d8] sm:$0xff]  ;;  %v857_v24 = vld [vmem:[#allocation5 + $0xec8] sm:$0xff]  ;;  %v2449_v26 = vpack.c.bf16 %v598_v18, %v594_v15  ;;  %v622_v56 = vld [vmem:[#allocation5 + $0x770] sm:$0xff] }
 0x156   : > { %2284 = vmatprep.subr.bf16.mxu0 %v2283_v36  ;;  %v820_v36 = vld [vmem:[#allocation5 + $0xda0] sm:$0xff]  ;;  %v607_v23 = vld [vmem:[#allocation5 + $0x6f8] sm:$0xff]  ;;  %v2323_v34 = vpack.c.bf16 %v861_v25, %v857_v24  ;;  %v877_v17 = vld [vmem:[#allocation5 + $0xf68] sm:$0xff] }
 0x157   : > { %2414 = vmatpush1.bf16.msra.mxu1 %v2413_v43  ;;  %v2305_v43 = vpack.c.bf16 %v820_v36, %v816_v32  ;;  %v602_v32 = vld [vmem:[#allocation5 + $0x6d0] sm:$0xff]  ;;  %v611_v36 = vld [vmem:[#allocation5 + $0x718] sm:$0xff] }
 0x158   : > { %2416 = vmatprep.subr.bf16.mxu1 %v2415_v45  ;;  %v824_v45 = vld [vmem:[#allocation5 + $0xdc0] sm:$0xff]  ;;  %v2453_v40 = vpack.c.bf16 %v606_v33, %v602_v32  ;;  %v638_v15 = vld [vmem:[#allocation5 + $0x7f0] sm:$0xff] }
 0x159   : > { %2286 = vmatpush1.bf16.msra.mxu0 %v2285_v44  ;;  %v2435_v44 = vpack.c.bf16 %v575_v38, %v571_v37  ;;  %v615_v37 = vld [vmem:[#allocation5 + $0x738] sm:$0xff]  ;;  %v865_v38 = vld [vmem:[#allocation5 + $0xf08] sm:$0xff]  ;;  %v3532_v33 = vld [vmem:[%s3485_s22 + $0x30] sm:$0xff] }
 0x15a   : > { %2288 = vmatprep.subr.bf16.mxu0 %v2287_v49  ;;  %v828_v49 = vld [vmem:[#allocation5 + $0xde0] sm:$0xff]  ;;  %v2327_v47 = vpack.c.bf16 %v869_v39, %v865_v38  ;;  %v663_v38 = vld [vmem:[#allocation5 + $0x8b8] sm:$0xff]  ;;  %v2892_v39 = vld [vmem:[%s3485_s22 + $0x10] sm:$0xff] }
 0x15b   : > { %2418 = vmatpush1.bf16.msra.mxu1 %v2417_v54  ;;  %v2309_v54 = vpack.c.bf16 %v828_v49, %v824_v45  ;;  %v610_v45 = vld [vmem:[#allocation5 + $0x710] sm:$0xff]  ;;  %v619_v49 = vld [vmem:[#allocation5 + $0x758] sm:$0xff] }
 0x15c   : > { %2420 = vmatprep.subr.bf16.mxu1 %v2419_v16  ;;  %v832_v16 = vld [vmem:[#allocation5 + $0xe00] sm:$0xff]  ;;  %v2457_v52 = vpack.c.bf16 %v614_v46, %v610_v45 }
 0x15d   : > { %2290 = vmatpush1.bf16.msra.mxu0 %v2289_v55  ;;  %v2439_v55 = vpack.c.bf16 %v583_v51, %v579_v50  ;;  %v623_v50 = vld [vmem:[#allocation5 + $0x778] sm:$0xff]  ;;  %v873_v51 = vld [vmem:[#allocation5 + $0xf48] sm:$0xff]  ;;  %v1490_v45 = vld [vmem:[#allocation7] sm:$0xff] }
 0x15e   : > { %2292 = vmatprep.subr.bf16.mxu0 %v2291_v59  ;;  %v836_v59 = vld [vmem:[#allocation5 + $0xe20] sm:$0xff]  ;;  %v2331_v57 = vpack.c.bf16 %v877_v17, %v873_v51 }
 0x15f   : > { %2422 = vmatpush1.bf16.msra.mxu1 %v2421_v1  ;;  %v2313_v1 = vpack.c.bf16 %v836_v59, %v832_v16  ;;  %v618_v16 = vld [vmem:[#allocation5 + $0x750] sm:$0xff]  ;;  %v627_v59 = vld [vmem:[#allocation5 + $0x798] sm:$0xff] }
 0x160   : > { %2424 = vmatprep.subr.bf16.mxu1 %v2423_v2  ;;  %v840_v2 = vld [vmem:[#allocation5 + $0xe40] sm:$0xff]  ;;  %v2461_v63 = vpack.c.bf16 %v622_v56, %v618_v16  ;;  %v667_v16 = vld [vmem:[#allocation5 + $0x8d8] sm:$0xff] }
 0x161   : > { %2294 = vmatpush1.bf16.msra.mxu0 %v2293_v19  ;;  %v2443_v19 = vpack.c.bf16 %v591_v61, %v587_v60  ;;  %v631_v60 = vld [vmem:[#allocation5 + $0x7b8] sm:$0xff]  ;;  %v881_v61 = vld [vmem:[#allocation5 + $0xf88] sm:$0xff] }
 0x162   : > { %2296 = vmatprep.subr.bf16.mxu0 %v2295_v6  ;;  %v844_v6 = vld [vmem:[#allocation5 + $0xe60] sm:$0xff]  ;;  %v2335_v4 = vpack.c.bf16 %v885_v62, %v881_v61  ;;  %v671_v56 = vld [vmem:[#allocation5 + $0x8f8] sm:$0xff] }
 0x163   : > { %2426 = vmatpush1.bf16.msra.mxu1 %v2425_v12  ;;  %v2317_v12 = vpack.c.bf16 %v844_v6, %v840_v2  ;;  %v626_v2 = vld [vmem:[#allocation5 + $0x790] sm:$0xff]  ;;  %v635_v6 = vld [vmem:[#allocation5 + $0x7d8] sm:$0xff]  ;;  %v1498_v62 = vld [vmem:[#allocation7 + $0x40] sm:$0xff] }
 0x164   : > { %2428 = vmatprep.subr.bf16.mxu1 %v2427_v14  ;;  %v848_v14 = vld [vmem:[#allocation5 + $0xe80] sm:$0xff]  ;;  %v2465_v10 = vpack.c.bf16 %v630_v3, %v626_v2  ;;  %v675_v2 = vld [vmem:[#allocation5 + $0x918] sm:$0xff] }
 0x165   : > { %2298 = vmatpush1.bf16.msra.mxu0 %v2297_v13  ;;  %v2447_v13 = vpack.c.bf16 %v599_v8, %v595_v7  ;;  %v639_v7 = vld [vmem:[#allocation5 + $0x7f8] sm:$0xff]  ;;  %v889_v8 = vld [vmem:[#allocation5 + $0xfc8] sm:$0xff] }
 0x166   : > { %2300 = vmatprep.subr.bf16.mxu0 %v2299_v21  ;;  %v852_v21 = vld [vmem:[#allocation5 + $0xea0] sm:$0xff]  ;;  %v2339_v18 = vpack.c.bf16 %v893_v9, %v889_v8  ;;  %v679_v3 = vld [vmem:[#allocation5 + $0x938] sm:$0xff]  ;;  %v1504_v9 = vld [vmem:[#allocation7 + $0x70] sm:$0xff] }
 0x167   : > { %2430 = vmatpush1.bf16.msra.mxu1 %v2429_v27  ;;  %v2321_v27 = vpack.c.bf16 %v852_v21, %v848_v14  ;;  %v634_v14 = vld [vmem:[#allocation5 + $0x7d0] sm:$0xff]  ;;  %v643_v21 = vld [vmem:[#allocation5 + $0x818] sm:$0xff]  ;;  %v1502_v8 = vld [vmem:[#allocation7 + $0x60] sm:$0xff] }
 0x168   : > { %2432 = vmatprep.subr.bf16.mxu1 %v2431_v31  ;;  %v856_v31 = vld [vmem:[#allocation5 + $0xec0] sm:$0xff] }
 0x169   : > { %2302 = vmatpush1.bf16.msra.mxu0 %v2301_v30  ;;  %v2451_v30 = vpack.c.bf16 %v607_v23, %v603_v22  ;;  %v647_v22 = vld [vmem:[#allocation5 + $0x838] sm:$0xff]  ;;  %v2469_v23 = vpack.c.bf16 %v638_v15, %v634_v14 }
 0x16a   : > { %2304 = vmatprep.subr.bf16.mxu0 %v2303_v35  ;;  %v860_v35 = vld [vmem:[#allocation5 + $0xee0] sm:$0xff]  ;;  %v2471_v25 = vpack.c.bf16 %v647_v22, %v643_v21  ;;  %v683_v14 = vld [vmem:[#allocation5 + $0x958] sm:$0xff]  ;;  %v682_v21 = vld [vmem:[#allocation5 + $0x950] sm:$0xff] }
 0x16b   : > { %2434 = vmatpush1.bf16.msra.mxu1 %v2433_v41  ;;  %v2325_v41 = vpack.c.bf16 %v860_v35, %v856_v31  ;;  %v655_v31 = vld [vmem:[#allocation5 + $0x878] sm:$0xff]  ;;  %v650_v35 = vld [vmem:[#allocation5 + $0x850] sm:$0xff] }
 0x16c   : > { %2436 = vmatprep.subr.bf16.mxu1 %v2435_v44  ;;  %v864_v44 = vld [vmem:[#allocation5 + $0xf00] sm:$0xff]  ;;  %v687_v15 = vld [vmem:[#allocation5 + $0x978] sm:$0xff] }
 0x16d   : > { %2306 = vmatpush1.bf16.msra.mxu0 %v2305_v43  ;;  %v2455_v43 = vpack.c.bf16 %v615_v37, %v611_v36  ;;  %v654_v36 = vld [vmem:[#allocation5 + $0x870] sm:$0xff]  ;;  %v659_v37 = vld [vmem:[#allocation5 + $0x898] sm:$0xff] }
 0x16e   : > { %2308 = vmatprep.subr.bf16.mxu0 %v2307_v48  ;;  %v868_v48 = vld [vmem:[#allocation5 + $0xf20] sm:$0xff]  ;;  %v2477_v46 = vpack.c.bf16 %v654_v36, %v650_v35  ;;  %v2479_v51 = vpack.c.bf16 %v663_v38, %v659_v37  ;;  %v690_v36 = vld [vmem:[#allocation5 + $0x990] sm:$0xff] }
 0x16f   : > { %2438 = vmatpush1.bf16.msra.mxu1 %v2437_v53  ;;  %v2329_v53 = vpack.c.bf16 %v868_v48, %v864_v44  ;;  %v1493_v44 = vld [vmem:[#allocation7 + $0x18] sm:$0xff]  ;;  %v1492_v48 = vld [vmem:[#allocation7 + $0x10] sm:$0xff]  ;;  %v1510_v38 = vld [vmem:[#allocation7 + $0xa0] sm:$0xff] }
 0x170   : > { %2440 = vmatprep.subr.bf16.mxu1 %v2439_v55  ;;  %v872_v55 = vld [vmem:[#allocation5 + $0xf40] sm:$0xff]  ;;  %v2601_v17 = vpack.c.bf16 %v1492_v48, %v1490_v45  ;;  %v699_v45 = vld [vmem:[#allocation5 + $0x9d8] sm:$0xff] }
 0x171   : > { %2310 = vmatpush1.bf16.msra.mxu0 %v2309_v54  ;;  %v2459_v54 = vpack.c.bf16 %v623_v50, %v619_v49  ;;  %v1495_v49 = vld [vmem:[#allocation7 + $0x28] sm:$0xff]  ;;  %v1497_v50 = vld [vmem:[#allocation7 + $0x38] sm:$0xff] }
 0x172   : > { %2312 = vmatprep.subr.bf16.mxu0 %v2311_v58  ;;  %v876_v58 = vld [vmem:[#allocation5 + $0xf60] sm:$0xff] }
 0x173   : > { %2442 = vmatpush1.bf16.msra.mxu1 %v2441_v0  ;;  %v2333_v0 = vpack.c.bf16 %v876_v58, %v872_v55  ;;  %v1499_v55 = vld [vmem:[#allocation7 + $0x48] sm:$0xff] }
 0x174   : > { %2444 = vmatprep.subr.bf16.mxu1 %v2443_v19  ;;  %v880_v19 = vld [vmem:[#allocation5 + $0xf80] sm:$0xff] }
 0x175   : > { %2314 = vmatpush1.bf16.msra.mxu0 %v2313_v1  ;;  %v2463_v1 = vpack.c.bf16 %v631_v60, %v627_v59  ;;  %v666_v60 = vld [vmem:[#allocation5 + $0x8d0] sm:$0xff] }
 0x176   : > { %2316 = vmatprep.subr.bf16.mxu0 %v2315_v5  ;;  %v884_v5 = vld [vmem:[#allocation5 + $0xfa0] sm:$0xff] }
 0x177   : > { %2446 = vmatpush1.bf16.msra.mxu1 %v2445_v11  ;;  %v2337_v11 = vpack.c.bf16 %v884_v5, %v880_v19  ;;  %v1505_v19 = vld [vmem:[#allocation7 + $0x78] sm:$0xff] }
 0x178   : > { %2448 = vmatprep.subr.bf16.mxu1 %v2447_v13  ;;  %v888_v13 = vld [vmem:[#allocation5 + $0xfc0] sm:$0xff] }
 0x179   : > { %2318 = vmatpush1.bf16.msra.mxu0 %v2317_v12  ;;  %v2467_v12 = vpack.c.bf16 %v639_v7, %v635_v6  ;;  %v674_v6 = vld [vmem:[#allocation5 + $0x910] sm:$0xff] }
 0x17a   : > { %2320 = vmatprep.subr.bf16.mxu0 %v2319_v20  ;;  %v892_v20 = vld [vmem:[#allocation5 + $0xfe0] sm:$0xff] }
 0x17b   : > { %2450 = vmatpush1.bf16.msra.mxu1 %v2449_v26  ;;  %v2341_v24 = vpack.c.bf16 %v892_v20, %v888_v13  ;;  %v642_v26 = vld [vmem:[#allocation5 + $0x810] sm:$0xff]  ;;  %v1509_v13 = vld [vmem:[#allocation7 + $0x98] sm:$0xff] }
 0x17c   : > { %2452 = vmatprep.subr.bf16.mxu1 %v2451_v30  ;;  %v651_v30 = vld [vmem:[#allocation5 + $0x858] sm:$0xff] }
 0x17d   : > { %2322 = vmatpush1.bf16.msra.mxu0 %v2321_v27  ;;  %v646_v27 = vld [vmem:[#allocation5 + $0x830] sm:$0xff] }
 0x17e   : > { %2324 = vmatprep.subr.bf16.mxu0 %v2323_v34  ;;  %v2473_v32 = vpack.c.bf16 %v646_v27, %v642_v26  ;;  %v2475_v34 = vpack.c.bf16 %v655_v31, %v651_v30  ;;  %v686_v26 = vld [vmem:[#allocation5 + $0x970] sm:$0xff]  ;;  %v1511_v27 = vld [vmem:[#allocation7 + $0xa8] sm:$0xff]  ;;  %v1513_v30 = vld [vmem:[#allocation7 + $0xb8] sm:$0xff] }
 0x17f   : > { %2454 = vmatpush1.bf16.msra.mxu1 %v2453_v40  ;;  %v658_v40 = vld [vmem:[#allocation5 + $0x890] sm:$0xff]  ;;  %v691_v31 = vld [vmem:[#allocation5 + $0x998] sm:$0xff]  ;;  %v2493_v35 = vpack.c.bf16 %v686_v26, %v682_v21  ;;  %v2619_v37 = vpack.c.bf16 %v1513_v30, %v1511_v27  ;;  %v1531_v26 = vld [vmem:[#allocation7 + $0x148] sm:$0xff] }
 0x180   : > { %2456 = vmatprep.subr.bf16.mxu1 %v2455_v43  ;;  %v1491_v43 = vld [vmem:[#allocation7 + $0x8] sm:$0xff]  ;;  %v1533_v27 = vld [vmem:[#allocation7 + $0x158] sm:$0xff] }
 0x181   : > { %2326 = vmatpush1.bf16.msra.mxu0 %v2325_v41  ;;  %v662_v41 = vld [vmem:[#allocation5 + $0x8b0] sm:$0xff]  ;;  %v731_v30 = vld [vmem:[#allocation5 + $0xad8] sm:$0xff] }
 0x182   : > { %2328 = vmatprep.subr.bf16.mxu0 %v2327_v47  ;;  %v2599_v47 = vpack.c.bf16 %v1493_v44, %v1491_v43  ;;  %v2481_v59 = vpack.c.bf16 %v662_v41, %v658_v40  ;;  %v694_v41 = vld [vmem:[#allocation5 + $0x9b0] sm:$0xff]  ;;  %v1515_v43 = vld [vmem:[#allocation7 + $0xc8] sm:$0xff]  ;;  %v1517_v44 = vld [vmem:[#allocation7 + $0xd8] sm:$0xff] }
 0x183   : > { %2458 = vmatpush1.bf16.msra.mxu1 %v2457_v52  ;;  %v2603_v52 = vpack.c.bf16 %v1497_v50, %v1495_v49  ;;  %v2497_v48 = vpack.c.bf16 %v694_v41, %v690_v36  ;;  %v698_v49 = vld [vmem:[#allocation5 + $0x9d0] sm:$0xff]  ;;  %v2623_v50 = vpack.c.bf16 %v1517_v44, %v1515_v43  ;;  %v2639_v36 = vpack.c.bf16 %v1533_v27, %v1531_v26  ;;  %v1535_v41 = vld [vmem:[#allocation7 + $0x168] sm:$0xff]  ;;  %v1537_v43 = vld [vmem:[#allocation7 + $0x178] sm:$0xff] }
 0x184   : > { %2460 = vmatprep.subr.bf16.mxu1 %v2459_v54  ;;  %v1496_v54 = vld [vmem:[#allocation7 + $0x30] sm:$0xff]  ;;  %v739_v44 = vld [vmem:[#allocation5 + $0xb18] sm:$0xff] }
 0x185   : > { %2330 = vmatpush1.bf16.msra.mxu0 %v2329_v53  ;;  %v1494_v53 = vld [vmem:[#allocation7 + $0x20] sm:$0xff]  ;;  %v770_v27 = vld [vmem:[#allocation5 + $0xc10] sm:$0xff] }
 0x186   : > { %2332 = vmatprep.subr.bf16.mxu0 %v2331_v57  ;;  %v1501_v57 = vld [vmem:[#allocation7 + $0x58] sm:$0xff]  ;;  %v2605_v58 = vpack.c.bf16 %v1496_v54, %v1494_v53  ;;  %v702_v53 = vld [vmem:[#allocation5 + $0x9f0] sm:$0xff]  ;;  %v1519_v54 = vld [vmem:[#allocation7 + $0xe8] sm:$0xff] }
 0x187   : > { %2462 = vmatpush1.bf16.msra.mxu1 %v2461_v63  ;;  %v2607_v61 = vpack.c.bf16 %v1501_v57, %v1499_v55  ;;  %v1500_v63 = vld [vmem:[#allocation7 + $0x50] sm:$0xff]  ;;  %v1521_v55 = vld [vmem:[#allocation7 + $0xf8] sm:$0xff] }
 0x188   : > { %2464 = vmatprep.subr.bf16.mxu1 %v2463_v1  ;;  %v1503_v1 = vld [vmem:[#allocation7 + $0x68] sm:$0xff] }
 0x189   : > { %2334 = vmatpush1.bf16.msra.mxu0 %v2333_v0  ;;  %v670_v0 = vld [vmem:[#allocation5 + $0x8f0] sm:$0xff]  ;;  %v2611_v7 = vpack.c.bf16 %v1505_v19, %v1503_v1  ;;  %v1525_v1 = vld [vmem:[#allocation7 + $0x118] sm:$0xff] }
 0x18a   : > { %2336 = vmatprep.subr.bf16.mxu0 %v2335_v4  ;;  %v2609_v4 = vpack.c.bf16 %v1500_v63, %v1498_v62  ;;  %v2485_v5 = vpack.c.bf16 %v670_v0, %v666_v60  ;;  %v2627_v60 = vpack.c.bf16 %v1521_v55, %v1519_v54  ;;  %v1520_v62 = vld [vmem:[#allocation7 + $0xf0] sm:$0xff]  ;;  %v1523_v0 = vld [vmem:[#allocation7 + $0x108] sm:$0xff]  ;;  %v715_v19 = vld [vmem:[#allocation5 + $0xa58] sm:$0xff] }
 0x18b   : > { %2466 = vmatpush1.bf16.msra.mxu1 %v2465_v10  ;;  %v2487_v10 = vpack.c.bf16 %v679_v3, %v675_v2  ;;  %v719_v2 = vld [vmem:[#allocation5 + $0xa78] sm:$0xff] }
 0x18c   : > { %2468 = vmatprep.subr.bf16.mxu1 %v2467_v12  ;;  %v1507_v12 = vld [vmem:[#allocation7 + $0x88] sm:$0xff]  ;;  %v1541_v54 = vld [vmem:[#allocation7 + $0x198] sm:$0xff] }
 0x18d   : > { %2338 = vmatpush1.bf16.msra.mxu0 %v2337_v11  ;;  %v678_v11 = vld [vmem:[#allocation5 + $0x930] sm:$0xff]  ;;  %v2615_v22 = vpack.c.bf16 %v1509_v13, %v1507_v12  ;;  %v1529_v12 = vld [vmem:[#allocation7 + $0x138] sm:$0xff] }
 0x18e   : > { %2340 = vmatprep.subr.bf16.mxu0 %v2339_v18  ;;  %v2613_v18 = vpack.c.bf16 %v1504_v9, %v1502_v8  ;;  %v2489_v20 = vpack.c.bf16 %v678_v11, %v674_v6  ;;  %v2631_v6 = vpack.c.bf16 %v1525_v1, %v1523_v0  ;;  %v1524_v8 = vld [vmem:[#allocation7 + $0x110] sm:$0xff]  ;;  %v2507_v9 = vpack.c.bf16 %v719_v2, %v715_v19  ;;  %v1527_v11 = vld [vmem:[#allocation7 + $0x128] sm:$0xff]  ;;  %v723_v13 = vld [vmem:[#allocation5 + $0xa98] sm:$0xff] }
 0x18f   : > { %2470 = vmatpush1.bf16.msra.mxu1 %v2469_v23  ;;  %v1506_v23 = vld [vmem:[#allocation7 + $0x80] sm:$0xff]  ;;  %v2635_v21 = vpack.c.bf16 %v1529_v12, %v1527_v11  ;;  %v747_v55 = vld [vmem:[#allocation5 + $0xb58] sm:$0xff] }
 0x190   : > { %2472 = vmatprep.subr.bf16.mxu1 %v2471_v25  ;;  %v2491_v25 = vpack.c.bf16 %v687_v15, %v683_v14  ;;  %v727_v14 = vld [vmem:[#allocation5 + $0xab8] sm:$0xff] }
 0x191   : > { %2342 = vmatpush1.bf16.msra.mxu0 %v2341_v24  ;;  %v1508_v24 = vld [vmem:[#allocation7 + $0x90] sm:$0xff]  ;;  %v1545_v0 = vld [vmem:[#allocation7 + $0x1b8] sm:$0xff] }
 0x192   : > { %1338 = vmatmul.mubr.f32.vlgmr.msra.gmra.mrb[2].mxu1 %v2892_v39  ;;  %2600 = vmatprep.subr.bf16.mxu0 %v2599_v47  ;;  %v1512_v39 = vld [vmem:[#allocation7 + $0xb0] sm:$0xff]  ;;  %v755_v1 = vld [vmem:[#allocation5 + $0xb98] sm:$0xff] }
 0x193   : > { %2474 = vmatpush1.bf16.msra.mxu1 %v2473_v32  ;;  %1408 = vmatprep.mubr.f32.mxu1 %v3518_v28  ;;  %v2483_v28 = vpack.c.bf16 %v671_v56, %v667_v16  ;;  %v695_v32 = vld [vmem:[#allocation5 + $0x9b8] sm:$0xff]  ;;  %v2621_v47 = vpack.c.bf16 %v1512_v39, %v1510_v38  ;;  %v1532_v38 = vld [vmem:[#allocation7 + $0x150] sm:$0xff] }
 0x194   : > { %1196 = vmatmul.mubr.f32.vlgmr.msra.gmra.mrb[0].mxu0 %v3532_v33  ;;  %2476 = vmatprep.subr.bf16.mxu1 %v2475_v34  ;;  %v2617_v34 = vpack.c.bf16 %v1508_v24, %v1506_v23  ;;  %v2495_v40 = vpack.c.bf16 %v695_v32, %v691_v31  ;;  %v707_v16 = vld [vmem:[#allocation5 + $0xa18] sm:$0xff]  ;;  %v1528_v23 = vld [vmem:[#allocation7 + $0x130] sm:$0xff]  ;;  %v2511_v24 = vpack.c.bf16 %v727_v14, %v723_v13 }
 0x195   : > { %2602 = vmatpush1.bf16.msra.mxu0 %v2601_v17  ;;  %v1516_v17 = vld [vmem:[#allocation7 + $0xd0] sm:$0xff]  ;;  %v711_v56 = vld [vmem:[#allocation5 + $0xa38] sm:$0xff] }
 0x196   : > { %2604 = vmatprep.subr.bf16.mxu0 %v2603_v52  ;;  %v2503_v63 = vpack.c.bf16 %v711_v56, %v707_v16  ;;  %v735_v31 = vld [vmem:[#allocation5 + $0xaf8] sm:$0xff] }
 0x197   : > { %2478 = vmatpush1.bf16.msra.mxu1 %v2477_v46  ;;  %v703_v46 = vld [vmem:[#allocation5 + $0x9f8] sm:$0xff]  ;;  %v2515_v39 = vpack.c.bf16 %v735_v31, %v731_v30  ;;  %v774_v30 = vld [vmem:[#allocation5 + $0xc30] sm:$0xff] }
 0x198   : > { %2480 = vmatprep.subr.bf16.mxu1 %v2479_v51  ;;  %v1514_v51 = vld [vmem:[#allocation7 + $0xc0] sm:$0xff]  ;;  %v2499_v52 = vpack.c.bf16 %v703_v46, %v699_v45  ;;  %v743_v45 = vld [vmem:[#allocation5 + $0xb38] sm:$0xff] }
 0x199   : > { %2606 = vmatpush1.bf16.msra.mxu0 %v2605_v58  ;;  %v2625_v57 = vpack.c.bf16 %v1516_v17, %v1514_v51  ;;  %v2501_v58 = vpack.c.bf16 %v702_v53, %v698_v49  ;;  %v2643_v49 = vpack.c.bf16 %v1537_v43, %v1535_v41  ;;  %v1536_v51 = vld [vmem:[#allocation7 + $0x170] sm:$0xff]  ;;  %v2519_v17 = vpack.c.bf16 %v743_v45, %v739_v44  ;;  %v1539_v53 = vld [vmem:[#allocation7 + $0x188] sm:$0xff]  ;;  %v751_v16 = vld [vmem:[#allocation5 + $0xb78] sm:$0xff] }
 0x19a   : > { %2608 = vmatprep.subr.bf16.mxu0 %v2607_v61  ;;  %v1518_v61 = vld [vmem:[#allocation7 + $0xe0] sm:$0xff]  ;;  %v759_v19 = vld [vmem:[#allocation5 + $0xbb8] sm:$0xff]  ;;  %v786_v43 = vld [vmem:[#allocation5 + $0xc90] sm:$0xff] }
 0x19b   : > { %2482 = vmatpush1.bf16.msra.mxu1 %v2481_v59  ;;  %v706_v59 = vld [vmem:[#allocation5 + $0xa10] sm:$0xff]  ;;  %v2629_v3 = vpack.c.bf16 %v1520_v62, %v1518_v61  ;;  %v2523_v62 = vpack.c.bf16 %v751_v16, %v747_v55  ;;  %v1549_v11 = vld [vmem:[#allocation7 + $0x1d8] sm:$0xff] }
 0x19c   : > { %2484 = vmatprep.subr.bf16.mxu1 %v2483_v28  ;;  %v710_v28 = vld [vmem:[#allocation5 + $0xa30] sm:$0xff]  ;;  %v763_v12 = vld [vmem:[#allocation5 + $0xbd8] sm:$0xff] }
 0x19d   : > { %2610 = vmatpush1.bf16.msra.mxu0 %v2609_v4  ;;  %v2505_v4 = vpack.c.bf16 %v710_v28, %v706_v59  ;;  %v2647_v59 = vpack.c.bf16 %v1541_v54, %v1539_v53  ;;  %v1540_v61 = vld [vmem:[#allocation7 + $0x190] sm:$0xff]  ;;  %v1543_v28 = vld [vmem:[#allocation7 + $0x1a8] sm:$0xff]  ;;  %v767_v13 = vld [vmem:[#allocation5 + $0xbf8] sm:$0xff] }
 0x19e   : > { %2612 = vmatprep.subr.bf16.mxu0 %v2611_v7  ;;  %v1522_v7 = vld [vmem:[#allocation7 + $0x100] sm:$0xff]  ;;  %v779_v31 = vld [vmem:[#allocation5 + $0xc58] sm:$0xff]  ;;  %v790_v44 = vld [vmem:[#allocation5 + $0xcb0] sm:$0xff] }
 0x19f   : > { %2486 = vmatpush1.bf16.msra.mxu1 %v2485_v5  ;;  %v714_v5 = vld [vmem:[#allocation5 + $0xa50] sm:$0xff]  ;;  %v2633_v15 = vpack.c.bf16 %v1524_v8, %v1522_v7  ;;  %v2527_v8 = vpack.c.bf16 %v759_v19, %v755_v1  ;;  %v795_v45 = vld [vmem:[#allocation5 + $0xcd8] sm:$0xff] }
 0x1a0   : > { %2488 = vmatprep.subr.bf16.mxu1 %v2487_v10  ;;  %v718_v10 = vld [vmem:[#allocation5 + $0xa70] sm:$0xff]  ;;  %v811_v54 = vld [vmem:[#allocation5 + $0xd58] sm:$0xff] }
 0x1a1   : > { %2614 = vmatpush1.bf16.msra.mxu0 %v2613_v18  ;;  %v2509_v18 = vpack.c.bf16 %v718_v10, %v714_v5  ;;  %v2651_v5 = vpack.c.bf16 %v1545_v0, %v1543_v28  ;;  %v1544_v7 = vld [vmem:[#allocation7 + $0x1b0] sm:$0xff]  ;;  %v1547_v10 = vld [vmem:[#allocation7 + $0x1c8] sm:$0xff]  ;;  %v815_v55 = vld [vmem:[#allocation5 + $0xd78] sm:$0xff] }
 0x1a2   : > { %2616 = vmatprep.subr.bf16.mxu0 %v2615_v22  ;;  %v1526_v22 = vld [vmem:[#allocation7 + $0x120] sm:$0xff]  ;;  %v802_v53 = vld [vmem:[#allocation5 + $0xd10] sm:$0xff] }
 0x1a3   : > { %2490 = vmatpush1.bf16.msra.mxu1 %v2489_v20  ;;  %v722_v20 = vld [vmem:[#allocation5 + $0xa90] sm:$0xff]  ;;  %v2637_v32 = vpack.c.bf16 %v1528_v23, %v1526_v22  ;;  %v771_v23 = vld [vmem:[#allocation5 + $0xc18] sm:$0xff] }
 0x1a4   : > { %2492 = vmatprep.subr.bf16.mxu1 %v2491_v25  ;;  %v726_v25 = vld [vmem:[#allocation5 + $0xab0] sm:$0xff] }
 0x1a5   : > { %2618 = vmatpush1.bf16.msra.mxu0 %v2617_v34  ;;  %v2513_v34 = vpack.c.bf16 %v726_v25, %v722_v20  ;;  %v2531_v20 = vpack.c.bf16 %v767_v13, %v763_v12  ;;  %v766_v22 = vld [vmem:[#allocation5 + $0xbf0] sm:$0xff] }
 0x1a6   : > { %2620 = vmatprep.subr.bf16.mxu0 %v2619_v37  ;;  %v1530_v37 = vld [vmem:[#allocation7 + $0x140] sm:$0xff]  ;;  %v818_v0 = vld [vmem:[#allocation5 + $0xd90] sm:$0xff] }
 0x1a7   : > { %2494 = vmatpush1.bf16.msra.mxu1 %v2493_v35  ;;  %v730_v35 = vld [vmem:[#allocation5 + $0xad0] sm:$0xff]  ;;  %v2641_v46 = vpack.c.bf16 %v1532_v38, %v1530_v37  ;;  %v787_v38 = vld [vmem:[#allocation5 + $0xc98] sm:$0xff] }
 0x1a8   : > { %2496 = vmatprep.subr.bf16.mxu1 %v2495_v40  ;;  %v734_v40 = vld [vmem:[#allocation5 + $0xaf0] sm:$0xff] }
 0x1a9   : > { %2622 = vmatpush1.bf16.msra.mxu0 %v2621_v47  ;;  %v2517_v47 = vpack.c.bf16 %v734_v40, %v730_v35  ;;  %v782_v37 = vld [vmem:[#allocation5 + $0xc70] sm:$0xff] }
 0x1aa   : > { %2624 = vmatprep.subr.bf16.mxu0 %v2623_v50  ;;  %v1534_v50 = vld [vmem:[#allocation7 + $0x160] sm:$0xff]  ;;  %v822_v1 = vld [vmem:[#allocation5 + $0xdb0] sm:$0xff] }
 0x1ab   : > { %2498 = vmatpush1.bf16.msra.mxu1 %v2497_v48  ;;  %v738_v48 = vld [vmem:[#allocation5 + $0xb10] sm:$0xff]  ;;  %v2645_v56 = vpack.c.bf16 %v1536_v51, %v1534_v50  ;;  %v803_v51 = vld [vmem:[#allocation5 + $0xd18] sm:$0xff] }
 0x1ac   : > { %2500 = vmatprep.subr.bf16.mxu1 %v2499_v52  ;;  %v742_v52 = vld [vmem:[#allocation5 + $0xb30] sm:$0xff] }
 0x1ad   : > { %2626 = vmatpush1.bf16.msra.mxu0 %v2625_v57  ;;  %v2521_v57 = vpack.c.bf16 %v742_v52, %v738_v48  ;;  %v798_v50 = vld [vmem:[#allocation5 + $0xcf0] sm:$0xff] }
 0x1ae   : > { %2628 = vmatprep.subr.bf16.mxu0 %v2627_v60  ;;  %v1538_v60 = vld [vmem:[#allocation7 + $0x180] sm:$0xff]  ;;  %v826_v13 = vld [vmem:[#allocation5 + $0xdd0] sm:$0xff] }
 0x1af   : > { %2502 = vmatpush1.bf16.msra.mxu1 %v2501_v58  ;;  %v746_v58 = vld [vmem:[#allocation5 + $0xb50] sm:$0xff]  ;;  %v2649_v2 = vpack.c.bf16 %v1540_v61, %v1538_v60  ;;  %v823_v60 = vld [vmem:[#allocation5 + $0xdb8] sm:$0xff] }
 0x1b0   : > { %2504 = vmatprep.subr.bf16.mxu1 %v2503_v63  ;;  %v750_v63 = vld [vmem:[#allocation5 + $0xb70] sm:$0xff] }
 0x1b1   : > { %2630 = vmatpush1.bf16.msra.mxu0 %v2629_v3  ;;  %v2525_v3 = vpack.c.bf16 %v750_v63, %v746_v58  ;;  %v814_v58 = vld [vmem:[#allocation5 + $0xd70] sm:$0xff] }
 0x1b2   : > { %2632 = vmatprep.subr.bf16.mxu0 %v2631_v6  ;;  %v1542_v6 = vld [vmem:[#allocation7 + $0x1a0] sm:$0xff]  ;;  %v1548_v63 = vld [vmem:[#allocation7 + $0x1d0] sm:$0xff] }
 0x1b3   : > { %2506 = vmatpush1.bf16.msra.mxu1 %v2505_v4  ;;  %v754_v4 = vld [vmem:[#allocation5 + $0xb90] sm:$0xff]  ;;  %v2653_v14 = vpack.c.bf16 %v1544_v7, %v1542_v6  ;;  %v1551_v6 = vld [vmem:[#allocation7 + $0x1e8] sm:$0xff]  ;;  %v1553_v7 = vld [vmem:[#allocation7 + $0x1f8] sm:$0xff] }
 0x1b4   : > { %2508 = vmatprep.subr.bf16.mxu1 %v2507_v9  ;;  %v758_v9 = vld [vmem:[#allocation5 + $0xbb0] sm:$0xff] }
 0x1b5   : > { %2634 = vmatpush1.bf16.msra.mxu0 %v2633_v15  ;;  %v2529_v15 = vpack.c.bf16 %v758_v9, %v754_v4  ;;  %v831_v4 = vld [vmem:[#allocation5 + $0xdf8] sm:$0xff]  ;;  %v2659_v9 = vpack.c.bf16 %v1553_v7, %v1551_v6  ;;  %v898_v7 = vlaneseq }
 0x1b6   : > { %2636 = vmatprep.subr.bf16.mxu0 %v2635_v21  ;;  %v762_v21 = vld [vmem:[#allocation5 + $0xbd0] sm:$0xff] }
 0x1b7   : > { %2510 = vmatpush1.bf16.msra.mxu1 %v2509_v18  ;;  %v2655_v18 = vpack.c.bf16 %v1549_v11, %v1547_v10  ;;  %v2533_v25 = vpack.c.bf16 %v766_v22, %v762_v21  ;;  %v1550_v10 = vld [vmem:[#allocation7 + $0x1e0] sm:$0xff]  ;;  %v1552_v11 = vld [vmem:[#allocation7 + $0x1f0] sm:$0xff] }
 0x1b8   : > { %2512 = vmatprep.subr.bf16.mxu1 %v2511_v24  ;;  %v775_v24 = vld [vmem:[#allocation5 + $0xc38] sm:$0xff] }
 0x1b9   : > { %2638 = vmatpush1.bf16.msra.mxu0 %v2637_v32  ;;  %v2535_v26 = vpack.c.bf16 %v775_v24, %v771_v23  ;;  %v783_v32 = vld [vmem:[#allocation5 + $0xc78] sm:$0xff]  ;;  %v834_v23 = vld [vmem:[#allocation5 + $0xe10] sm:$0xff] }
 0x1ba   : > { %2640 = vmatprep.subr.bf16.mxu0 %v2639_v36  ;;  %v2539_v35 = vpack.c.bf16 %v783_v32, %v779_v31  ;;  %v778_v36 = vld [vmem:[#allocation5 + $0xc50] sm:$0xff] }
 0x1bb   : > { %2514 = vmatpush1.bf16.msra.mxu1 %v2513_v34  ;;  %v2537_v34 = vpack.c.bf16 %v774_v30, %v770_v27  ;;  %v2541_v40 = vpack.c.bf16 %v782_v37, %v778_v36  ;;  %v838_v24 = vld [vmem:[#allocation5 + $0xe30] sm:$0xff]  ;;  %v1555_v27 = vld [vmem:[#allocation7 + $0x208] sm:$0xff]  ;;  %v1557_v30 = vld [vmem:[#allocation7 + $0x218] sm:$0xff] }
 0x1bc   : > { %2516 = vmatprep.subr.bf16.mxu1 %v2515_v39  ;;  %v791_v39 = vld [vmem:[#allocation5 + $0xcb8] sm:$0xff]  ;;  %v2663_v31 = vpack.c.bf16 %v1557_v30, %v1555_v27  ;;  %v2569_v32 = vpack.c.bf16 %v838_v24, %v834_v23  ;;  %v846_v36 = vld [vmem:[#allocation5 + $0xe70] sm:$0xff]  ;;  %v1559_v24 = vld [vmem:[#allocation7 + $0x228] sm:$0xff] }
 0x1bd   : > { %2642 = vmatpush1.bf16.msra.mxu0 %v2641_v46  ;;  %v2543_v41 = vpack.c.bf16 %v791_v39, %v787_v38  ;;  %v799_v46 = vld [vmem:[#allocation5 + $0xcf8] sm:$0xff]  ;;  %v1558_v30 = vld [vmem:[#allocation7 + $0x220] sm:$0xff] }
 0x1be   : > { %2644 = vmatprep.subr.bf16.mxu0 %v2643_v49  ;;  %v2547_v48 = vpack.c.bf16 %v799_v46, %v795_v45  ;;  %v794_v49 = vld [vmem:[#allocation5 + $0xcd0] sm:$0xff]  ;;  %v851_v37 = vld [vmem:[#allocation5 + $0xe98] sm:$0xff] }
 0x1bf   : > { %2518 = vmatpush1.bf16.msra.mxu1 %v2517_v47  ;;  %v2545_v47 = vpack.c.bf16 %v790_v44, %v786_v43  ;;  %v855_v38 = vld [vmem:[#allocation5 + $0xeb8] sm:$0xff]  ;;  %v854_v43 = vld [vmem:[#allocation5 + $0xeb0] sm:$0xff] }
 0x1c0   : > { %2520 = vmatprep.subr.bf16.mxu1 %v2519_v17  ;;  %v807_v17 = vld [vmem:[#allocation5 + $0xd38] sm:$0xff] }
 0x1c1   : > { %2646 = vmatpush1.bf16.msra.mxu0 %v2645_v56  ;;  %v2551_v52 = vpack.c.bf16 %v807_v17, %v803_v51  ;;  %v2555_v56 = vpack.c.bf16 %v815_v55, %v811_v54  ;;  %v859_v44 = vld [vmem:[#allocation5 + $0xed8] sm:$0xff] }
 0x1c2   : > { %2648 = vmatprep.subr.bf16.mxu0 %v2647_v59  ;;  %v819_v59 = vld [vmem:[#allocation5 + $0xd98] sm:$0xff] }
 0x1c3   : > { %2522 = vmatpush1.bf16.msra.mxu1 %v2521_v57  ;;  %v810_v57 = vld [vmem:[#allocation5 + $0xd50] sm:$0xff]  ;;  %v2559_v28 = vpack.c.bf16 %v823_v60, %v819_v59  ;;  %v863_v45 = vld [vmem:[#allocation5 + $0xef8] sm:$0xff] }
 0x1c4   : > { %2524 = vmatprep.subr.bf16.mxu1 %v2523_v62  ;;  %v2557_v61 = vpack.c.bf16 %v814_v58, %v810_v57  ;;  %v1546_v62 = vld [vmem:[#allocation7 + $0x1c0] sm:$0xff]  ;;  %v871_v51 = vld [vmem:[#allocation5 + $0xf38] sm:$0xff]  ;;  %v878_v57 = vld [vmem:[#allocation5 + $0xf70] sm:$0xff] }
 0x1c5   : > { %2650 = vmatpush1.bf16.msra.mxu0 %v2649_v2  ;;  %v2657_v19 = vpack.c.bf16 %v1548_v63, %v1546_v62  ;;  %v879_v54 = vld [vmem:[#allocation5 + $0xf78] sm:$0xff]  ;;  %v882_v62 = vld [vmem:[#allocation5 + $0xf90] sm:$0xff] }
 0x1c6   : > { %2652 = vmatprep.subr.bf16.mxu0 %v2651_v5  ;;  %v883_v58 = vld [vmem:[#allocation5 + $0xf98] sm:$0xff]  ;;  %v886_v63 = vld [vmem:[#allocation5 + $0xfb0] sm:$0xff] }
 0x1c7   : > { %2526 = vmatpush1.bf16.msra.mxu1 %v2525_v3  ;;  %v827_v3 = vld [vmem:[#allocation5 + $0xdd8] sm:$0xff] }
 0x1c8   : > { %2528 = vmatprep.subr.bf16.mxu1 %v2527_v8  ;;  %v2561_v8 = vpack.c.bf16 %v822_v1, %v818_v0  ;;  %v2563_v12 = vpack.c.bf16 %v831_v4, %v827_v3  ;;  %v887_v59 = vld [vmem:[#allocation5 + $0xfb8] sm:$0xff]  ;;  %v2593_v1 = vpack.c.bf16 %v886_v63, %v882_v62  ;;  %v890_v3 = vld [vmem:[#allocation5 + $0xfd0] sm:$0xff] }
 0x1c9   : > { %2654 = vmatpush1.bf16.msra.mxu0 %v2653_v14  ;;  %v830_v14 = vld [vmem:[#allocation5 + $0xdf0] sm:$0xff]  ;;  %v895_v0 = vld [vmem:[#allocation5 + $0xff8] sm:$0xff] }
 0x1ca   : > { %2656 = vmatprep.subr.bf16.mxu0 %v2655_v18  ;;  %v835_v18 = vld [vmem:[#allocation5 + $0xe18] sm:$0xff]  ;;  %v2565_v21 = vpack.c.bf16 %v830_v14, %v826_v13  ;;  %v894_v4 = vld [vmem:[#allocation5 + $0xff0] sm:$0xff] }
 0x1cb   : > { %2530 = vmatpush1.bf16.msra.mxu1 %v2529_v15  ;;  %v2661_v15 = vpack.c.bf16 %v1552_v11, %v1550_v10  ;;  %v2597_v6 = vpack.c.bf16 %v894_v4, %v890_v3  ;;  %v3547_v10 = vld [vmem:[#allocation10] sm:$0xf]  ;;  %v1573_v62 = vld [vmem:[#allocation7 + $0x298] sm:$0xff]  ;;  %v1799_v4 = vld [vmem:[#allocation8 + $0xc8] sm:$0xff] }
 0x1cc   : > { %2532 = vmatprep.subr.bf16.mxu1 %v2531_v20  ;;  %v839_v20 = vld [vmem:[#allocation5 + $0xe38] sm:$0xff]  ;;  %v1798_v3 = vld [vmem:[#allocation8 + $0xc0] sm:$0xff] }
 0x1cd   : > { %2658 = vmatpush1.bf16.msra.mxu0 %v2657_v19  ;;  %v2567_v22 = vpack.c.bf16 %v839_v20, %v835_v18 }
 0x1ce   : > { %2660 = vmatprep.subr.bf16.mxu0 %v2659_v9 }
 0x1cf   : > { %2534 = vmatpush1.bf16.msra.mxu1 %v2533_v25  ;;  %v843_v25 = vld [vmem:[#allocation5 + $0xe58] sm:$0xff] }
 0x1d0   : > { %2536 = vmatprep.subr.bf16.mxu1 %v2535_v26  ;;  %v847_v26 = vld [vmem:[#allocation5 + $0xe78] sm:$0xff] }
 0x1d1   : > { %2662 = vmatpush1.bf16.msra.mxu0 %v2661_v15 }
 0x1d2   : > { %1409 = vmatmul.mubr.f32.vlgmr.msra.gmra.mrb[2].mxu1 %v3522_v29  ;;  %v2549_v29 = vpack.c.bf16 %v798_v50, %v794_v49  ;;  %2664 = vmatprep.subr.bf16.mxu0 %v2663_v31  ;;  %v862_v49 = vld [vmem:[#allocation5 + $0xef0] sm:$0xff]  ;;  %v867_v50 = vld [vmem:[#allocation5 + $0xf18] sm:$0xff] }
 0x1d3   : > { %2538 = vmatpush1.bf16.msra.mxu1 %v2537_v34  ;;  %1479 = vmatprep.mubr.f32.mxu1 %v3526_v42  ;;  %v806_v42 = vld [vmem:[#allocation5 + $0xd30] sm:$0xff]  ;;  %v2571_v34 = vpack.c.bf16 %v847_v26, %v843_v25  ;;  %v1561_v25 = vld [vmem:[#allocation7 + $0x238] sm:$0xff] }
 0x1d4   : > { %2540 = vmatprep.subr.bf16.mxu1 %v2539_v35  ;;  %v2553_v16 = vpack.c.bf16 %v806_v42, %v802_v53  ;;  %v842_v35 = vld [vmem:[#allocation5 + $0xe50] sm:$0xff]  ;;  %v875_v42 = vld [vmem:[#allocation5 + $0xf58] sm:$0xff] }
 0x1d5   : > { %v2573_v39 = vpack.c.bf16 %v846_v36, %v842_v35  ;;  %v870_v53 = vld [vmem:[#allocation5 + $0xf30] sm:$0xff]  ;;  %v1563_v35 = vld [vmem:[#allocation7 + $0x248] sm:$0xff]  ;;  %v1565_v36 = vld [vmem:[#allocation7 + $0x258] sm:$0xff] }
 0x1d7   : > { %2542 = vmatpush1.bf16.msra.mxu1 %v2541_v40  ;;  %v2575_v40 = vpack.c.bf16 %v855_v38, %v851_v37  ;;  %v1791_v37 = vld [vmem:[#allocation8 + $0x88] sm:$0xff] }
 0x1d8   : > { %2544 = vmatprep.subr.bf16.mxu1 %v2543_v41  ;;  %v850_v41 = vld [vmem:[#allocation5 + $0xe90] sm:$0xff] }
 0x1d9   : > { %v2577_v46 = vpack.c.bf16 %v854_v43, %v850_v41  ;;  %v1793_v41 = vld [vmem:[#allocation8 + $0x98] sm:$0xff] }
 0x1db   : > { %2546 = vmatpush1.bf16.msra.mxu1 %v2545_v47  ;;  %v2579_v47 = vpack.c.bf16 %v863_v45, %v859_v44 }
 0x1dc   : > { %2548 = vmatprep.subr.bf16.mxu1 %v2547_v48  ;;  %v858_v48 = vld [vmem:[#allocation5 + $0xed0] sm:$0xff] }
 0x1dd   : > { %v2581_v17 = vpack.c.bf16 %v862_v49, %v858_v48  ;;  %v1794_v48 = vld [vmem:[#allocation8 + $0xa0] sm:$0xff]  ;;  %v2671_v49 = vpack.c.bf16 %v1565_v36, %v1563_v35  ;;  %v1785_v35 = vld [vmem:[#allocation8 + $0x58] sm:$0xff] }
 0x1df   : > { %2550 = vmatpush1.bf16.msra.mxu1 %v2549_v29  ;;  %v2583_v29 = vpack.c.bf16 %v871_v51, %v867_v50  ;;  %v1562_v50 = vld [vmem:[#allocation7 + $0x240] sm:$0xff]  ;;  %v1564_v51 = vld [vmem:[#allocation7 + $0x250] sm:$0xff] }
 0x1e0   : > { %2552 = vmatprep.subr.bf16.mxu1 %v2551_v52  ;;  %v866_v52 = vld [vmem:[#allocation5 + $0xf10] sm:$0xff] }
 0x1e1   : > { %v2585_v55 = vpack.c.bf16 %v870_v53, %v866_v52  ;;  %v1569_v52 = vld [vmem:[#allocation7 + $0x278] sm:$0xff] }
 0x1e3   : > { %2554 = vmatpush1.bf16.msra.mxu1 %v2553_v16  ;;  %v2587_v16 = vpack.c.bf16 %v879_v54, %v875_v42  ;;  %v1778_v54 = vld [vmem:[#allocation8 + $0x20] sm:$0xff] }
 0x1e4   : > { %2556 = vmatprep.subr.bf16.mxu1 %v2555_v56  ;;  %v874_v56 = vld [vmem:[#allocation5 + $0xf50] sm:$0xff] }
 0x1e5   : > { %v3539_v2 = vpop.f32.mrb[0].mxu1  ;;  %v2589_v60 = vpack.c.bf16 %v878_v57, %v874_v56  ;;  %v1796_v56 = vld [vmem:[#allocation8 + $0xb0] sm:$0xff]  ;;  %v1797_v57 = vld [vmem:[#allocation8 + $0xb8] sm:$0xff] }
 0x1e6   : > { %v3541_v5 = vpop.f32.mrb[1].mxu1 }
 0x1e7   : > { %2558 = vmatpush1.bf16.msra.mxu1 %v2557_v61  ;;  %v2591_v61 = vpack.c.bf16 %v887_v59, %v883_v58  ;;  %v1566_v59 = vld [vmem:[#allocation7 + $0x260] sm:$0xff] }
 0x1e8   : > { %2560 = vmatprep.subr.bf16.mxu1 %v2559_v28  ;;  %v891_v28 = vld [vmem:[#allocation5 + $0xfd8] sm:$0xff] }
 0x1e9   : > { %v2595_v19 = vpack.c.bf16 %v895_v0, %v891_v28  ;;  %v2739_v28 = vpack.c.bf16 %v1797_v57, %v1796_v56  ;;  %v1780_v0 = vld [vmem:[#allocation8 + $0x30] sm:$0xff]  ;;  %v1595_v57 = vld [vmem:[#allocation7 + $0x348] sm:$0xff] }
 0x1ea   : > { %v1592_v56 = vld [vmem:[#allocation7 + $0x330] sm:$0xff] }
 0x1eb   : > { %2562 = vmatpush1.bf16.msra.mxu1 %v2561_v8  ;;  %v3544_v8 = vshrl.u32 %v898_v7, 7  ;;  %v1570_v7 = vld [vmem:[#allocation7 + $0x280] sm:$0xff] }
 0x1ec   : > { %2564 = vmatprep.subr.bf16.mxu1 %v2563_v12 }
 0x1ed   : > { %v900_v9 = vsub.s32 0, %v3544_v8  ;;  %v904_v11 = vsub.s32 1, %v3544_v8 }
 0x1ef   : > { %2566 = vmatpush1.bf16.msra.mxu1 %v2565_v21  ;;  %v901_v12 = vrot.slane %v3547_v10, %v900_v9  ;;  %v905_v13 = vrot.slane %v3547_v10, %v904_v11  ;;  %v1554_v21 = vld [vmem:[#allocation7 + $0x200] sm:$0xff] }
 0x1f0   : > { %2568 = vmatprep.subr.bf16.mxu1 %v2567_v22  ;;  %v1556_v22 = vld [vmem:[#allocation7 + $0x210] sm:$0xff] }
 0x1f1   : > { %v985_v14 = vadd.f32 %v3539_v2, %v901_v12  ;;  %v2665_v27 = vpack.c.bf16 %v1556_v22, %v1554_v21  ;;  %v1790_v2 = vld [vmem:[#allocation8 + $0x80] sm:$0xff]  ;;  %v1572_v12 = vld [vmem:[#allocation7 + $0x290] sm:$0xff] }
 0x1f2   : > { %v2727_v38 = vpack.c.bf16 %v1791_v37, %v1790_v2  ;;  %v2681_v21 = vpack.c.bf16 %v1572_v12, %v1570_v7  ;;  %v1800_v22 = vld [vmem:[#allocation8 + $0xd0] sm:$0xff]  ;;  %v1802_v2 = vld [vmem:[#allocation8 + $0xe0] sm:$0xff]  ;;  %v1803_v37 = vld [vmem:[#allocation8 + $0xe8] sm:$0xff] }
 0x1f3   : > { %2570 = vmatpush1.bf16.msra.mxu1 %v2569_v32  ;;  %v2667_v32 = vpack.c.bf16 %v1561_v25, %v1559_v24  ;;  %v1574_v25 = vld [vmem:[#allocation7 + $0x2a0] sm:$0xff] }
 0x1f4   : > { %2572 = vmatprep.subr.bf16.mxu1 %v2571_v34  ;;  %v1560_v34 = vld [vmem:[#allocation7 + $0x230] sm:$0xff] }
 0x1f5   : > { %v2669_v43 = vpack.c.bf16 %v1560_v34, %v1558_v30  ;;  %v1581_v30 = vld [vmem:[#allocation7 + $0x2d8] sm:$0xff]  ;;  %v1784_v34 = vld [vmem:[#allocation8 + $0x50] sm:$0xff] }
 0x1f7   : > { %2574 = vmatpush1.bf16.msra.mxu1 %v2573_v39  ;;  %v1775_v39 = vld [vmem:[#allocation8 + $0x8] sm:$0xff] }
 0x1f8   : > { %2576 = vmatprep.subr.bf16.mxu1 %v2575_v40  ;;  %v1792_v40 = vld [vmem:[#allocation8 + $0x90] sm:$0xff] }
 0x1f9   : > { %v2731_v45 = vpack.c.bf16 %v1793_v41, %v1792_v40  ;;  %v1583_v40 = vld [vmem:[#allocation7 + $0x2e8] sm:$0xff]  ;;  %v1585_v41 = vld [vmem:[#allocation7 + $0x2f8] sm:$0xff] }
 0x1fb   : > { %2578 = vmatpush1.bf16.msra.mxu1 %v2577_v46  ;;  %v1776_v46 = vld [vmem:[#allocation8 + $0x10] sm:$0xff] }
 0x1fc   : > { %2580 = vmatprep.subr.bf16.mxu1 %v2579_v47  ;;  %v1777_v47 = vld [vmem:[#allocation8 + $0x18] sm:$0xff] }
 0x1fd   : > { %v2733_v53 = vpack.c.bf16 %v1777_v47, %v1776_v46  ;;  %v2691_v46 = vpack.c.bf16 %v1585_v41, %v1583_v40  ;;  %v1582_v47 = vld [vmem:[#allocation7 + $0x2e0] sm:$0xff] }
 0x1ff   : > { %2582 = vmatpush1.bf16.msra.mxu1 %v2581_v17  ;;  %v1795_v17 = vld [vmem:[#allocation8 + $0xa8] sm:$0xff] }
 0x200   : > { %2584 = vmatprep.subr.bf16.mxu1 %v2583_v29  ;;  %v1567_v29 = vld [vmem:[#allocation7 + $0x268] sm:$0xff]  ;;  %v2735_v42 = vpack.c.bf16 %v1795_v17, %v1794_v48  ;;  %v1584_v48 = vld [vmem:[#allocation7 + $0x2f0] sm:$0xff] }
 0x201   : > { %v2675_v58 = vpack.c.bf16 %v1569_v52, %v1567_v29  ;;  %v1586_v29 = vld [vmem:[#allocation7 + $0x300] sm:$0xff]  ;;  %v1588_v52 = vld [vmem:[#allocation7 + $0x310] sm:$0xff] }
 0x203   : > { %2586 = vmatpush1.bf16.msra.mxu1 %v2585_v55  ;;  %v1779_v55 = vld [vmem:[#allocation8 + $0x28] sm:$0xff] }
 0x204   : > { %2588 = vmatprep.subr.bf16.mxu1 %v2587_v16  ;;  %v2673_v16 = vpack.c.bf16 %v1564_v51, %v1562_v50  ;;  %v2737_v63 = vpack.c.bf16 %v1779_v55, %v1778_v54  ;;  %v1589_v50 = vld [vmem:[#allocation7 + $0x318] sm:$0xff]  ;;  %v2693_v51 = vpack.c.bf16 %v1584_v48, %v1582_v47  ;;  %v2697_v54 = vpack.c.bf16 %v1588_v52, %v1586_v29  ;;  %v1786_v48 = vld [vmem:[#allocation8 + $0x60] sm:$0xff]  ;;  %v1788_v52 = vld [vmem:[#allocation8 + $0x70] sm:$0xff] }
 0x207   : > { %2590 = vmatpush1.bf16.msra.mxu1 %v2589_v60  ;;  %v1568_v60 = vld [vmem:[#allocation7 + $0x270] sm:$0xff] }
 0x208   : > { %2592 = vmatprep.subr.bf16.mxu1 %v2591_v61  ;;  %v1571_v61 = vld [vmem:[#allocation7 + $0x288] sm:$0xff] }
 0x20b   : > { %2594 = vmatpush1.bf16.msra.mxu1 %v2593_v1  ;;  %v1781_v1 = vld [vmem:[#allocation8 + $0x38] sm:$0xff] }
 0x20c   : > { %2596 = vmatprep.subr.bf16.mxu1 %v2595_v19  ;;  %v2677_v19 = vpack.c.bf16 %v1568_v60, %v1566_v59 }
 0x20f   : > { %2598 = vmatpush1.bf16.msra.mxu1 %v2597_v6  ;;  %v2679_v6 = vpack.c.bf16 %v1573_v62, %v1571_v61  ;;  %v1594_v61 = vld [vmem:[#allocation7 + $0x340] sm:$0xff]  ;;  %v1596_v62 = vld [vmem:[#allocation7 + $0x350] sm:$0xff] }
 0x210   : > { %2728 = vmatprep.subr.bf16.mxu1 %v2727_v38  ;;  %v1578_v38 = vld [vmem:[#allocation7 + $0x2c0] sm:$0xff] }
 0x212   : > { %1480 = vmatmul.mubr.f32.vlgmr.msra.gmra.mrb[2].mxu1 %v3532_v33  ;;  %v987_v33 = vadd.f32 %v3541_v5, %v905_v13  ;;  %v1774_v5 = vld [vmem:[#allocation8] sm:$0xff]  ;;  %v1575_v13 = vld [vmem:[#allocation7 + $0x2a8] sm:$0xff] }
 0x213   : > { %v2729_v44 = vpack.c.bf16 %v1775_v39, %v1774_v5  ;;  %v1580_v39 = vld [vmem:[#allocation7 + $0x2d0] sm:$0xff] }
 0x215   : > { %2730 = vmatpush3.bf16.msra.mxu1 %v2729_v44  ;;  %v2751_v44 = vpack.c.bf16 %v1803_v37, %v1802_v2  ;;  %v1616_v2 = vld [vmem:[#allocation7 + $0x3f0] sm:$0xff] }
 0x216   : > { %2732 = vmatprep.subr.bf16.mxu1 %v2731_v45  ;;  %v2689_v45 = vpack.c.bf16 %v1580_v39, %v1578_v38  ;;  %v912_v38 = vsub.s32 3, %v3544_v8 }
 0x218   : > { %v913_v40 = vrot.slane %v3547_v10, %v912_v38 }
 0x219   : > { %2734 = vmatpush3.bf16.msra.mxu1 %v2733_v53  ;;  %v1591_v53 = vld [vmem:[#allocation7 + $0x328] sm:$0xff] }
 0x21a   : > { %2736 = vmatprep.subr.bf16.mxu1 %v2735_v42  ;;  %v1593_v42 = vld [vmem:[#allocation7 + $0x338] sm:$0xff] }
 0x21b   : > { %v2699_v55 = vpack.c.bf16 %v1593_v42, %v1591_v53  ;;  %v1789_v53 = vld [vmem:[#allocation8 + $0x78] sm:$0xff] }
 0x21c   : > { %v2757_v42 = vpack.c.bf16 %v1789_v53, %v1788_v52 }
 0x21d   : > { %2738 = vmatpush3.bf16.msra.mxu1 %v2737_v63  ;;  %v1599_v63 = vld [vmem:[#allocation7 + $0x368] sm:$0xff] }
 0x21e   : > { %2740 = vmatprep.subr.bf16.mxu1 %v2739_v28  ;;  %v1601_v28 = vld [vmem:[#allocation7 + $0x378] sm:$0xff] }
 0x267   : > { %v1197_v15 = vpop.f32.mrb[0].mxu0 }
 0x268   : > { %v2760_v18 = vadd.f32 %v1197_v15, %v985_v14  ;;  %v1199_v20 = vpop.f32.mrb[1].mxu0  ;;  %v1577_v14 = vld [vmem:[#allocation7 + $0x2b8] sm:$0xff]  ;;  %v2743_v15 = vpack.c.bf16 %v1799_v4, %v1798_v3  ;;  %v1600_v3 = vld [vmem:[#allocation7 + $0x370] sm:$0xff]  ;;  %v1603_v4 = vld [vmem:[#allocation7 + $0x388] sm:$0xff] }
 0x269   : > { %v2762_v23 = vadd.f32 %v1199_v20, %v987_v33  ;;  %v2741_v33 = vpack.c.bf16 %v1781_v1, %v1780_v0  ;;  %v1783_v20 = vld [vmem:[#allocation8 + $0x48] sm:$0xff]  ;;  %v2683_v24 = vpack.c.bf16 %v1577_v14, %v1575_v13  ;;  %v2705_v0 = vpack.c.bf16 %v1596_v62, %v1594_v61  ;;  %v1602_v13 = vld [vmem:[#allocation7 + $0x380] sm:$0xff]  ;;  %v1604_v14 = vld [vmem:[#allocation7 + $0x390] sm:$0xff] }
 0x26a   : > { %v1486_v31 = vmax.f32 %v2760_v18, 0.0  ;;  %v1782_v18 = vld [vmem:[#allocation8 + $0x40] sm:$0xff]  ;;  %v2707_v1 = vpack.c.bf16 %v1601_v28, %v1599_v63 }
 0x26b   : > { %v1487_v26 = vmax.f32 %v2762_v23, 0.0  ;;  %v1801_v23 = vld [vmem:[#allocation8 + $0xd8] sm:$0xff]  ;;  %2742 = vmatpush3.bf16.msra.mxu1 %v2741_v33  ;;  %v1607_v33 = vld [vmem:[#allocation7 + $0x3a8] sm:$0xff]  ;;  %v2046_v62 = vld [vmem:[#allocation13] ss:$0 sm:$0xff] }
 0x26c   : > { %2744 = vmatprep.subr.bf16.mxu1 %v2743_v15  ;;  %v1609_v15 = vld [vmem:[#allocation7 + $0x3b8] sm:$0xff] }
 0x26d   : > { %1694 = vmatprep.mubr.f32.mxu0 %v1487_v26  ;;  %v1576_v26 = vld [vmem:[#allocation7 + $0x2b0] sm:$0xff] }
 0x26e   : > { %1695 = vmatmul.mubr.f32.vlgmr.msra.gmra.mrb[2].mxu0 %v1486_v31  ;;  %v2745_v31 = vpack.c.bf16 %v1783_v20, %v1782_v18  ;;  %v2685_v36 = vpack.c.bf16 %v1576_v26, %v1574_v25  ;;  %v2713_v18 = vpack.c.bf16 %v1604_v14, %v1602_v13  ;;  %v2715_v20 = vpack.c.bf16 %v1609_v15, %v1607_v33 }
 0x26f   : > { %2666 = vmatpush1.bf16.msra.mxu0 %v2665_v27  ;;  %v1579_v27 = vld [vmem:[#allocation7 + $0x2c8] sm:$0xff] }
 0x270   : > { %2668 = vmatprep.subr.bf16.mxu0 %v2667_v32  ;;  %v2747_v32 = vpack.c.bf16 %v1801_v23, %v1800_v22  ;;  %v2687_v5 = vpack.c.bf16 %v1581_v30, %v1579_v27  ;;  %2746 = vmatpush3.bf16.msra.mxu1 %v2745_v31  ;;  %v1608_v22 = vld [vmem:[#allocation7 + $0x3b0] sm:$0xff]  ;;  %v1611_v23 = vld [vmem:[#allocation7 + $0x3c8] sm:$0xff]  ;;  %v1610_v27 = vld [vmem:[#allocation7 + $0x3c0] sm:$0xff] }
 0x271   : > { %v1612_v30 = vld [vmem:[#allocation7 + $0x3d0] sm:$0xff]  ;;  %v1615_v31 = vld [vmem:[#allocation7 + $0x3e8] sm:$0xff] }
 0x272   : > { %2748 = vmatprep.subr.bf16.mxu1 %v2747_v32  ;;  %v1617_v32 = vld [vmem:[#allocation7 + $0x3f8] sm:$0xff] }
 0x273   : > { %2670 = vmatpush1.bf16.msra.mxu0 %v2669_v43  ;;  %v2749_v43 = vpack.c.bf16 %v1785_v35, %v1784_v34  ;;  %v2721_v34 = vpack.c.bf16 %v1612_v30, %v1610_v27  ;;  %v2723_v35 = vpack.c.bf16 %v1617_v32, %v1615_v31 }
 0x274   : > { %2672 = vmatprep.subr.bf16.mxu0 %v2671_v49  ;;  %v1587_v49 = vld [vmem:[#allocation7 + $0x308] sm:$0xff] }
 0x275   : > { %2750 = vmatpush3.bf16.msra.mxu1 %v2749_v43  ;;  %v2695_v17 = vpack.c.bf16 %v1589_v50, %v1587_v49  ;;  %v1787_v49 = vld [vmem:[#allocation8 + $0x68] sm:$0xff] }
 0x276   : > { %2752 = vmatprep.subr.bf16.mxu1 %v2751_v44  ;;  %v2753_v50 = vpack.c.bf16 %v1787_v49, %v1786_v48 }
 0x277   : > { %2674 = vmatpush1.bf16.msra.mxu0 %v2673_v16  ;;  %v1590_v16 = vld [vmem:[#allocation7 + $0x320] sm:$0xff] }
 0x278   : > { %2676 = vmatprep.subr.bf16.mxu0 %v2675_v58  ;;  %v1597_v58 = vld [vmem:[#allocation7 + $0x358] sm:$0xff]  ;;  %v2701_v59 = vpack.c.bf16 %v1592_v56, %v1590_v16 }
 0x279   : > { %v2703_v60 = vpack.c.bf16 %v1597_v58, %v1595_v57  ;;  %2754 = vmatpush3.bf16.msra.mxu1 %v2753_v50 }
 0x27b   : > { %2678 = vmatpush1.bf16.msra.mxu0 %v2677_v19  ;;  %v1598_v19 = vld [vmem:[#allocation7 + $0x360] sm:$0xff] }
 0x27c   : > { %2680 = vmatprep.subr.bf16.mxu0 %v2679_v6  ;;  %v1605_v6 = vld [vmem:[#allocation7 + $0x398] sm:$0xff]  ;;  %v2709_v7 = vpack.c.bf16 %v1600_v3, %v1598_v19 }
 0x27d   : > { %v2711_v12 = vpack.c.bf16 %v1605_v6, %v1603_v4 }
 0x27f   : > { %2682 = vmatpush1.bf16.msra.mxu0 %v2681_v21  ;;  %v1606_v21 = vld [vmem:[#allocation7 + $0x3a0] sm:$0xff] }
 0x280   : > { %2684 = vmatprep.subr.bf16.mxu0 %v2683_v24  ;;  %v1613_v24 = vld [vmem:[#allocation7 + $0x3d8] sm:$0xff]  ;;  %v2717_v25 = vpack.c.bf16 %v1608_v22, %v1606_v21 }
 0x281   : > { %v2719_v26 = vpack.c.bf16 %v1613_v24, %v1611_v23 }
 0x283   : > { %2686 = vmatpush1.bf16.msra.mxu0 %v2685_v36  ;;  %v1614_v36 = vld [vmem:[#allocation7 + $0x3e0] sm:$0xff] }
 0x284   : > { %2688 = vmatprep.subr.bf16.mxu0 %v2687_v5  ;;  %v2725_v37 = vpack.c.bf16 %v1616_v2, %v1614_v36  ;;  %v908_v5 = vsub.s32 2, %v3544_v8 }
 0x286   : > { %v909_v39 = vrot.slane %v3547_v10, %v908_v5  ;;  %v1618_v10 = vld [vmem:[#allocation11] sm:$0x3] }
 0x287   : > { %2690 = vmatpush1.bf16.msra.mxu0 %v2689_v45 }
 0x288   : > { %2692 = vmatprep.subr.bf16.mxu0 %v2691_v46 }
 0x28b   : > { %2694 = vmatpush1.bf16.msra.mxu0 %v2693_v51  ;;  %v1804_v51 = vld [vmem:[#allocation8 + $0xf0] sm:$0xff] }
 0x28c   : > { %2696 = vmatprep.subr.bf16.mxu0 %v2695_v17  ;;  %v1805_v17 = vld [vmem:[#allocation8 + $0xf8] sm:$0xff] }
 0x28d   : > { %v2755_v29 = vpack.c.bf16 %v1805_v17, %v1804_v51 }
 0x28f   : > { %2698 = vmatpush1.bf16.msra.mxu0 %v2697_v54  ;;  %2756 = vmatprep.subr.bf16.mxu1 %v2755_v29  ;;  %v1623_v54 = vrot.slane %v1618_v10, %v900_v9 }
 0x290   : > { %2700 = vmatprep.subr.bf16.mxu0 %v2699_v55  ;;  %2758 = vmatpush3.bf16.msra.mxu1 %v2757_v42  ;;  %v1627_v55 = vrot.slane %v1618_v10, %v904_v11 }
 0x293   : > { %2702 = vmatpush1.bf16.msra.mxu0 %v2701_v59 }
 0x294   : > { %2704 = vmatprep.subr.bf16.mxu0 %v2703_v60 }
 0x297   : > { %2706 = vmatpush1.bf16.msra.mxu0 %v2705_v0 }
 0x298   : > { %2708 = vmatprep.subr.bf16.mxu0 %v2707_v1 }
 0x29b   : > { %2710 = vmatpush1.bf16.msra.mxu0 %v2709_v7 }
 0x29c   : > { %2712 = vmatprep.subr.bf16.mxu0 %v2711_v12 }
 0x29f   : > { %2714 = vmatpush1.bf16.msra.mxu0 %v2713_v18 }
 0x2a0   : > { %2716 = vmatprep.subr.bf16.mxu0 %v2715_v20 }
 0x2a3   : > { %2718 = vmatpush1.bf16.msra.mxu0 %v2717_v25 }
 0x2a4   : > { %2720 = vmatprep.subr.bf16.mxu0 %v2719_v26 }
 0x2a7   : > { %2722 = vmatpush1.bf16.msra.mxu0 %v2721_v34 }
 0x2a8   : > { %2724 = vmatprep.subr.bf16.mxu0 %v2723_v35 }
 0x2ab   : > { %2726 = vmatpush1.bf16.msra.mxu0 %v2725_v37 }
 0x2e5   : > { %v1481_v41 = vpop.f32.mrb[2].mxu1 }
 0x2e6   : > { %v2763_v43 = vadd.f32 %v1481_v41, %v909_v39  ;;  %v1483_v44 = vpop.f32.mrb[3].mxu1 }
 0x2e7   : > { %v2764_v45 = vadd.f32 %v1483_v44, %v913_v40 }
 0x2e8   : > { %v1488_v47 = vmax.f32 %v2763_v43, 0.0 }
 0x2e9   : > { %v1489_v46 = vmax.f32 %v2764_v45, 0.0 }
 0x2eb   : > { %1765 = vmatprep.mubr.f32.mxu0 %v1489_v46 }
 0x2ec   : > { %1766 = vmatmul.mubr.f32.vlgmr.msra.gmra.mrb[2].mxu0 %v1488_v47 }
 0x3bf   : > { %v1767_v16 = vpop.f32.mrb[2].mxu0 }
 0x3c0   : > { %v2765_v56 = vadd.f32 %v1767_v16, %v1623_v54  ;;  %v1769_v57 = vpop.f32.mrb[3].mxu0 }
 0x3c1   : > { %v2766_v58 = vadd.f32 %v1769_v57, %v1627_v55 }
 0x3c2   : > { %v1772_v60 = vmax.f32 %v2765_v56, 0.0 }
 0x3c3   : > { %v1773_v59 = vmax.f32 %v2766_v58, 0.0 }
 0x3c5   : > { %1877 = vmatprep.mubr.f32.mxu1 %v1773_v59 }
 0x3c6   : > { %1878 = vmatmul.mubr.f32.vlgmr.msra.gmra.mrb[4].mxu1 %v1772_v60 }
 0x499   : > { %v2084_v61 = vpop.f32.mrb[4].mxu1 }
 0x49a   : > { %v2085_v63 = vpop.f32.mrb[5].mxu1 }
 0x49b   : > { %v2086_v9 = vadd.f32 %v2085_v63, %v2084_v61 }
 0x49d   : > { %v1880_v8 = vadd.f32 %v2086_v9, %v2046_v62 }
 0x49f   : > { %1883 = vst [vmem:[%s375_s17] sm:$0xff] %v1880_v8 }
 0x4a0   : > { %3104 = shalt.err (!%p3101_p1)
}
 0x4a1   : > { %s3105_s20 = scalar_lea.hbm %s3571_s29, 128  ;;  %s3109_s8 = scalar_lea.hbm %s3622_s7, 256 }
 0x4a2   : > { %p3106_p7 = scmp.ne.s32.totalorder %s3571_s29, %s3105_s20  ;;  %p3110_p8 = scmp.lt.u32.totalorder %s3571_s29, %s3622_s7 }
 0x4a3   : > { %p3111_p0 = scmp.lt.u32.totalorder %s3109_s8, %s3105_s20  ;;  %p3113_p6 = scmp.lt.u32.totalorder %s3105_s20, %s3571_s29 }
 0x4a4   : > { %p3107_p9 = pnand %p3106_p7, %p3642_p5 }
 0x4a5   : > { %p3112_p2 = por %p3111_p0, %p3110_p8 }
 0x4a6   : > { %p3108_p4 = pneg %p3107_p9 }
 0x4a7   : > { %p3114_p10 = por %p3113_p6, %p3112_p2 }
 0x4a9   : > { %p3115_p11 = pnand %p3114_p10, %p3108_p4 }
 0x4ab   : > { %3118 = shalt.err (!%p3115_p11)
}
 0x4ac   : > { %2805 = dma.vmem_to_hbm [thread:$0]  (%p3642_p5), %s3573_s23, 128, %s3571_s29, %s1885_s13  }
 0x4ad PF: > { %s1910_s11 = sand.u32 1, %s3157_s24   ;;  %p3643_p3 = scmp.ne.s32.totalorder %s3633_s12, 0 }
 0x4ae   : > { %p3644_p12 = scmp.ge.s32.totalorder %s3169_s27, 2  ;;  %s1911_s18 = scalar_lea.sflag [#allocation4], %s1910_s11 }
 0x4b0   : > { %p2831_p13 = pnand %p3644_p12, %p3643_p3 }
 0x4b2   : > { %3152 = dma.done.wait (!%p2831_p13), %s1911_s18, 128  }
 0x4b3   : > { %3154 = vsyncadd (!%p2831_p13), %s1911_s18, 4294967168  ;;  %p23_p1 = scmp.ge.s32.totalorder %s3405_s19, 4   ;;  %s3645_s24 = smov %s3161_s25 }
 0x4b4   : > { %s3646_s25 = smov %s3165_s26  ;;  %s3647_s26 = smov %s3416_s21 }
 0x4b5   : > { %s3648_s27 = smov %s3405_s19  ;;  %25 = sbr.rel (!%p23_p1) target bundleno = 8 (0x8), region = 117 }
 0x4bc   :  { %1916 = vsyncpa [#allocation3], 1 }
 0x4bd   :  { %1918 = vsyncpa [#allocation3 + $0x1], 1 }
 0x4be   :  { %1919 = vsyncpa [#allocation6], 1 }
 0x4bf   :  { %1920 = vsyncpa [#allocation9], 1 }
 0x4c0   :  { %1921 = vsyncpa [#allocation12], 1 }
 0x4c1   :  { %1922 = vsyncpa [#allocation4], 1 }
 0x4c2   :  { %1924 = vsyncpa [#allocation4 + $0x1], 1 }

</bundles_post_ra>
